<compile_context>
chip_gen: v6e
topology: v6e:2x2x1
jax: 0.10.0
libtpu: 0.0.40
codegen_flags: <defaults>
</compile_context>

<pallas_src>
import functools

import jax
import jax.numpy as jnp
from jax.experimental import pallas as pl
from jax.experimental.pallas import tpu as pltpu

_MB = 1024 * 1024


# ----------------------------------------------------------------------------
# helpers
# ----------------------------------------------------------------------------
def _round_up(x, m):
    return (x + m - 1) // m * m


@functools.lru_cache(maxsize=1)
def _vmem_budget_bytes():
    """Per-kernel VMEM budget derived from the chip's physical VMEM."""
    try:
        cap = pltpu.get_tpu_info().vmem_capacity_bytes
    except Exception:  # conservative fallback (assume v7x-sized VMEM)
        cap = 64 * _MB
    # Leave ~half of physical VMEM as headroom for pipelining / compiler scratch.
    return max(24 * _MB, cap // 2 - 8 * _MB)


def _linear_vmem_bytes(tm, K, N, act_itemsize, w_itemsize, has_residual):
    # double-buffered x / out (/residual) row tiles + double-buffered resident
    # weight + small bias / LN vectors.
    tiles = tm * K + tm * N + (tm * N if has_residual else 0)
    return 2 * tiles * act_itemsize + 2 * K * N * w_itemsize + 4 * (K + N) * 4


def _choose_tm(m, K, N, act_itemsize, w_itemsize, has_residual, tm_max=512):
    """Largest row tile that (a) fits the VMEM budget and (b) leaves >=2 grid steps
    when there is enough work (so the 'parallel' axis splits across v7x's 2 TCs)."""
    tm = min(tm_max, _round_up(m, 8))
    if m > 8 and pl.cdiv(m, tm) < 2:
        tm = max(8, _round_up(pl.cdiv(m, 2), 8))
    budget = _vmem_budget_bytes()
    while tm > 8 and _linear_vmem_bytes(tm, K, N, act_itemsize, w_itemsize,
                                        has_residual) > budget:
        tm = max(8, _round_up(tm // 2, 8))
    return tm


# ----------------------------------------------------------------------------
# kernels
# ----------------------------------------------------------------------------
def _make_linear_kernel(has_ln, has_bias, has_residual, activation, ln_eps):
    """y = [LN(x)] @ w (+ b) (-> gelu) (+ residual); f32 accumulation, cast at store."""

    def kernel(*refs):
        idx = 0
        x_ref = refs[idx]
        idx += 1
        w_ref = refs[idx]
        idx += 1
        if has_ln:
            g_ref = refs[idx]
            bta_ref = refs[idx + 1]
            idx += 2
        if has_bias:
            b_ref = refs[idx]
            idx += 1
        if has_residual:
            r_ref = refs[idx]
            idx += 1
        o_ref = refs[idx]

        if has_ln:
            xf = x_ref[...].astype(jnp.float32)
            mu = jnp.mean(xf, axis=-1, keepdims=True)
            var = jnp.mean(jnp.square(xf - mu), axis=-1, keepdims=True)
            xf = (xf - mu) * jax.lax.rsqrt(var + ln_eps)
            xf = xf * g_ref[...].astype(jnp.float32) + bta_ref[...].astype(jnp.float32)
            x = xf.astype(w_ref.dtype)
        else:
            x = x_ref[...]

        acc = jnp.dot(x, w_ref[...], preferred_element_type=jnp.float32)
        if has_bias:
            acc = acc + b_ref[...].astype(jnp.float32)
        if activation == "gelu":
            # TODO(synk): nn.GELU() defaults to the exact erf GELU; the tanh
            # approximation is used for a guaranteed EUP lowering (diff ~1e-3).
            acc = jax.nn.gelu(acc, approximate=True)
        if has_residual:
            acc = acc + r_ref[...].astype(jnp.float32)
        o_ref[...] = acc.astype(o_ref.dtype)

    return kernel


def _patch_embed_kernel(x_ref, w_ref, b_ref, cls_ref, pos_ref, o_ref):
    """Patch-embed linear fused with cls-token prepend + positional-embedding add."""
    x = x_ref[0]                                           # (n, patch_dim)
    body = jnp.dot(x, w_ref[...], preferred_element_type=jnp.float32)
    body = body + b_ref[...].astype(jnp.float32)           # (n, dim)
    cls_row = cls_ref[...].astype(jnp.float32)              # (1, dim)
    out = jnp.concatenate([cls_row, body], axis=0)          # (n + 1, dim)
    out = out + pos_ref[0].astype(jnp.float32)
    o_ref[0] = out.astype(o_ref.dtype)


def _attention_kernel(qkv_ref, o_ref, *, heads, dim_head, scale):
    """All heads of one image per step.  qkv block (1, S, 3*inner) ->
    lane-dense output block (1, S, inner)."""
    x = qkv_ref[0]                                           # (S, 3*inner), native dtype
    inner = heads * dim_head
    outs = []
    for h in range(heads):                                   # static unroll
        q = x[:, h * dim_head:(h + 1) * dim_head]
        k = x[:, inner + h * dim_head:inner + (h + 1) * dim_head]
        v = x[:, 2 * inner + h * dim_head:2 * inner + (h + 1) * dim_head]
        s = jnp.dot(q, k.T, preferred_element_type=jnp.float32) * scale
        m = jnp.max(s, axis=-1, keepdims=True)
        p = jnp.exp(s - m)
        denom = jnp.sum(p, axis=-1, keepdims=True)
        attn = p * pl.reciprocal(denom, approx=True)
        outs.append(jnp.dot(attn.astype(v.dtype), v,
                            preferred_element_type=jnp.float32))
    o = jnp.concatenate(outs, axis=-1)                       # (S, inner) single store
    o_ref[0] = o.astype(o_ref.dtype)


# ----------------------------------------------------------------------------
# pallas_call wrappers
# ----------------------------------------------------------------------------
def linear(x, w, b=None, residual=None, ln=None, activation=None,
           ln_eps=1e-5, tm_max=512):
    """x: (M, K), w: (K, N) pre-transposed, b: (N,), residual: (M, N),
    ln: optional (gamma, beta) each (K,) fused before the matmul.  -> (M, N)."""
    M, K = x.shape
    N = w.shape[1]
    act_bytes = x.dtype.itemsize
    tm = _choose_tm(M, K, N, act_bytes, w.dtype.itemsize, residual is not None, tm_max)
    grid_m = pl.cdiv(M, tm)

    inputs = [x, w]
    in_specs = [
        pl.BlockSpec((tm, K), lambda i: (i, 0)),
        # Weight / bias / LN blocks have a constant index_map -> VMEM-resident.
        # TODO(synk): pipeline_mode=pl.Buffered(1) would halve their footprint;
        # left off pending lowering support in top-level pallas_call grids.
        pl.BlockSpec((K, N), lambda i: (0, 0)),
    ]
    if ln is not None:
        g, beta = ln
        inputs += [g.reshape(1, K), beta.reshape(1, K)]
        in_specs += [pl.BlockSpec((1, K), lambda i: (0, 0)),
                     pl.BlockSpec((1, K), lambda i: (0, 0))]
    if b is not None:
        inputs.append(b.reshape(1, N))
        in_specs.append(pl.BlockSpec((1, N), lambda i: (0, 0)))
    if residual is not None:
        inputs.append(residual)
        in_specs.append(pl.BlockSpec((tm, N), lambda i: (i, 0)))

    kernel = _make_linear_kernel(ln is not None, b is not None,
                                 residual is not None, activation, ln_eps)

    bytes_accessed = (M * K + M * N) * act_bytes + K * N * w.dtype.itemsize
    if residual is not None:
        bytes_accessed += M * N * act_bytes
    if b is not None:
        bytes_accessed += N * act_bytes
    if ln is not None:
        bytes_accessed += 2 * K * 4

    cp_kwargs = dict(dimension_semantics=("parallel",))
    vmem_need = _linear_vmem_bytes(tm, K, N, act_bytes, w.dtype.itemsize,
                                   residual is not None)
    if vmem_need > 30 * _MB:
        # Big resident weight + big row tile: raise the scoped-VMEM limit (only
        # reachable on 128-MiB parts; on v7x the budget already shrank tm).
        cp_kwargs["vmem_limit_bytes"] = int(min(vmem_need + 8 * _MB, 100 * _MB))

    return pl.pallas_call(
        kernel,
        out_shape=jax.ShapeDtypeStruct((M, N), x.dtype),
        grid_spec=pltpu.PrefetchScalarGridSpec(
            num_scalar_prefetch=0,
            grid=(grid_m,),
            in_specs=in_specs,
            out_specs=pl.BlockSpec((tm, N), lambda i: (i, 0)),
        ),
        compiler_params=pltpu.CompilerParams(**cp_kwargs),
        cost_estimate=pl.CostEstimate(
            flops=2 * M * K * N,
            transcendentals=M * N if activation == "gelu" else 0,
            bytes_accessed=int(bytes_accessed),
        ),
    )(*inputs)


def patch_embed(x_patches, w, b, cls_token, pos):
    """x_patches: (B, n, patch_dim) -> (B, n+1, dim) with cls row and pos-emb fused."""
    B, n, patch_dim = x_patches.shape
    dim = w.shape[1]
    S = n + 1
    return pl.pallas_call(
        _patch_embed_kernel,
        out_shape=jax.ShapeDtypeStruct((B, S, dim), x_patches.dtype),
        grid_spec=pltpu.PrefetchScalarGridSpec(
            num_scalar_prefetch=0,
            grid=(B,),
            in_specs=[
                pl.BlockSpec((1, n, patch_dim), lambda i: (i, 0, 0)),
                pl.BlockSpec((patch_dim, dim), lambda i: (0, 0)),
                pl.BlockSpec((1, dim), lambda i: (0, 0)),
                pl.BlockSpec((1, dim), lambda i: (0, 0)),
                pl.BlockSpec((1, S, dim), lambda i: (0, 0, 0)),
            ],
            out_specs=pl.BlockSpec((1, S, dim), lambda i: (i, 0, 0)),
        ),
        compiler_params=pltpu.CompilerParams(dimension_semantics=("parallel",)),
        cost_estimate=pl.CostEstimate(
            flops=2 * B * n * patch_dim * dim,
            transcendentals=0,
            bytes_accessed=int((B * n * patch_dim + B * S * dim) * x_patches.dtype.itemsize
                               + patch_dim * dim * w.dtype.itemsize),
        ),
    )(x_patches, w, b.reshape(1, dim), cls_token.reshape(1, dim),
      pos.reshape(1, S, dim))


def attention(qkv, *, heads, dim_head, scale):
    """qkv: (B, S, 3*inner) -> (B, S, inner); per-batch grid step handles all heads."""
    B, S, three_inner = qkv.shape
    inner = heads * dim_head
    return pl.pallas_call(
        functools.partial(_attention_kernel, heads=heads, dim_head=dim_head, scale=scale),
        out_shape=jax.ShapeDtypeStruct((B, S, inner), qkv.dtype),
        grid_spec=pltpu.PrefetchScalarGridSpec(
            num_scalar_prefetch=0,
            grid=(B,),
            in_specs=[pl.BlockSpec((1, S, three_inner), lambda b: (b, 0, 0))],
            out_specs=pl.BlockSpec((1, S, inner), lambda b: (b, 0, 0)),
        ),
        compiler_params=pltpu.CompilerParams(dimension_semantics=("parallel",)),
        cost_estimate=pl.CostEstimate(
            flops=4 * B * heads * S * S * dim_head,
            transcendentals=B * heads * S * S,
            bytes_accessed=int((B * S * three_inner + B * S * inner) * qkv.dtype.itemsize),
        ),
    )(qkv)


# ----------------------------------------------------------------------------
# ViT forward (Pallas kernels for all heavy ops)
# ----------------------------------------------------------------------------
def vit_forward(img, params, *, patch_size, heads, dim_head, pool="cls"):
    B, C, H, W = img.shape
    p = patch_size
    hh, ww = H // p, W // p
    n = hh * ww
    dim = params["w_pe"].shape[1]
    inner = heads * dim_head
    scale = dim_head ** -0.5
    S = n + 1

    # Rearrange 'b c (h p1) (w p2) -> b (h w) (p1 p2 c)'  (pure relayout, kept in XLA)
    x = img.reshape(B, C, hh, p, ww, p)
    x = jnp.transpose(x, (0, 2, 4, 3, 5, 1)).reshape(B, n, p * p * C)

    # Patch embedding fused with cls-token prepend + positional embedding
    # (dropout p=0 -> identity).
    x = patch_embed(x, params["w_pe"], params["b_pe"], params["cls_token"],
                    params["pos_embedding"][:, :S])          # (B, S, dim)
    x2 = x.reshape(B * S, dim)

    for layer in params["layers"]:
        # --- PreNorm(LN1) fused into the QKV projection, then attention ---
        qkv = linear(x2, layer["w_qkv"], ln=(layer["ln1_g"], layer["ln1_b"]))
        attn_out = attention(qkv.reshape(B, S, 3 * inner),
                             heads=heads, dim_head=dim_head, scale=scale)
        attn_out = attn_out.reshape(B * S, inner)             # free contiguous reshape
        # out projection fused with the residual add
        x2 = linear(attn_out, layer["w_o"], layer["b_o"], residual=x2)

        # --- PreNorm(LN2) fused into FF1 (+GELU), FF2 fused with residual ---
        h1 = linear(x2, layer["w_ff1"], layer["b_ff1"],
                    ln=(layer["ln2_g"], layer["ln2_b"]), activation="gelu")
        x2 = linear(h1, layer["w_ff2"], layer["b_ff2"], residual=x2)

    x = x2.reshape(B, S, dim)
    x = jnp.mean(x, axis=1) if pool == "mean" else x[:, 0]
    return x  # to_latent is Identity


# ----------------------------------------------------------------------------
# pure-JAX reference (same math, HIGHEST-precision matmuls)
# ----------------------------------------------------------------------------
def _ref_layernorm(x, g, b, eps=1e-5):
    mu = jnp.mean(x, axis=-1, keepdims=True)
    var = jnp.mean(jnp.square(x - mu), axis=-1, keepdims=True)
    return (x - mu) * jax.lax.rsqrt(var + eps) * g + b


def vit_reference(img, params, *, patch_size, heads, dim_head, pool="cls"):
    HI = jax.lax.Precision.HIGHEST
    B, C, H, W = img.shape
    p = patch_size
    hh, ww = H // p, W // p
    n = hh * ww
    scale = dim_head ** -0.5

    x = img.reshape(B, C, hh, p, ww, p)
    x = jnp.transpose(x, (0, 2, 4, 3, 5, 1)).reshape(B, n, p * p * C)
    x = jnp.einsum("bnk,kd->bnd", x, params["w_pe"], precision=HI) + params["b_pe"]

    cls = jnp.broadcast_to(params["cls_token"], (B, 1, x.shape[-1]))
    x = jnp.concatenate([cls, x], axis=1)
    x = x + params["pos_embedding"][:, : n + 1]

    for layer in params["layers"]:
        hln = _ref_layernorm(x, layer["ln1_g"], layer["ln1_b"])
        qkv = jnp.einsum("bnd,dk->bnk", hln, layer["w_qkv"], precision=HI)
        q, k, v = jnp.split(qkv, 3, axis=-1)

        def to_heads(t):
            return jnp.transpose(t.reshape(B, -1, heads, dim_head), (0, 2, 1, 3))

        q, k, v = to_heads(q), to_heads(k), to_heads(v)
        dots = jnp.einsum("bhqd,bhkd->bhqk", q, k, precision=HI) * scale
        attn = jax.nn.softmax(dots, axis=-1)
        out = jnp.einsum("bhqk,bhkd->bhqd", attn, v, precision=HI)
        out = jnp.transpose(out, (0, 2, 1, 3)).reshape(B, -1, heads * dim_head)
        x = jnp.einsum("bnk,kd->bnd", out, layer["w_o"], precision=HI) + layer["b_o"] + x

        hln = _ref_layernorm(x, layer["ln2_g"], layer["ln2_b"])
        h1 = jax.nn.gelu(
            jnp.einsum("bnd,dk->bnk", hln, layer["w_ff1"], precision=HI) + layer["b_ff1"],
            approximate=True,
        )
        x = jnp.einsum("bnk,kd->bnd", h1, layer["w_ff2"], precision=HI) + layer["b_ff2"] + x

    return jnp.mean(x, axis=1) if pool == "mean" else x[:, 0]


# ----------------------------------------------------------------------------
# parameter init (deterministic)
# ----------------------------------------------------------------------------
def init_params(key, *, channels, patch_size, dim, depth, heads, dim_head, mlp_dim,
                num_patches):
    patch_dim = channels * patch_size * patch_size
    inner = heads * dim_head

    def dense(k, fan_in, fan_out, bias=True):
        kw, kb = jax.random.split(k)
        bound = 1.0 / (fan_in ** 0.5)
        w = jax.random.uniform(kw, (fan_in, fan_out), jnp.float32, -bound, bound)
        if not bias:
            return w, None
        b = jax.random.uniform(kb, (fan_out,), jnp.float32, -bound, bound)
        return w, b

    keys = jax.random.split(key, 3 + depth)
    w_pe, b_pe = dense(keys[0], patch_dim, dim)
    pos = jax.random.normal(keys[1], (1, num_patches + 1, dim), jnp.float32)
    cls = jax.random.normal(keys[2], (1, 1, dim), jnp.float32)

    layers = []
    for i in range(depth):
        lk = jax.random.split(keys[3 + i], 8)
        w_qkv, _ = dense(lk[0], dim, 3 * inner, bias=False)
        w_o, b_o = dense(lk[1], inner, dim)
        w_ff1, b_ff1 = dense(lk[2], dim, mlp_dim)
        w_ff2, b_ff2 = dense(lk[3], mlp_dim, dim)
        layers.append(
            dict(
                ln1_g=1.0 + 0.05 * jax.random.normal(lk[4], (dim,), jnp.float32),
                ln1_b=0.05 * jax.random.normal(lk[5], (dim,), jnp.float32),
                w_qkv=w_qkv,
                w_o=w_o,
                b_o=b_o,
                ln2_g=1.0 + 0.05 * jax.random.normal(lk[6], (dim,), jnp.float32),
                ln2_b=0.05 * jax.random.normal(lk[7], (dim,), jnp.float32),
                w_ff1=w_ff1,
                b_ff1=b_ff1,
                w_ff2=w_ff2,
                b_ff2=b_ff2,
            )
        )
    return dict(w_pe=w_pe, b_pe=b_pe, pos_embedding=pos, cls_token=cls, layers=layers)


# ----------------------------------------------------------------------------
# main
# ----------------------------------------------------------------------------
if __name__ == "__main__":
    B = 2
    image_size = 16
    patch_size = 4
    channels = 4
    dim = 32
    depth = 2
    heads = 4
    dim_head = 8
    mlp_dim = 64
    pool = "cls"
    num_patches = (image_size // patch_size) ** 2

    key = jax.random.PRNGKey(0)
    kimg, kparams = jax.random.split(key)
    img = jax.random.normal(kimg, (B, channels, image_size, image_size), jnp.float32)
    params = init_params(
        kparams,
        channels=channels,
        patch_size=patch_size,
        dim=dim,
        depth=depth,
        heads=heads,
        dim_head=dim_head,
        mlp_dim=mlp_dim,
        num_patches=num_patches,
    )

    fwd = jax.jit(
        functools.partial(
            vit_forward, patch_size=patch_size, heads=heads, dim_head=dim_head, pool=pool
        )
    )
    y = fwd(img, params)
    y = jax.block_until_ready(y)

    ref = vit_reference(
        img, params, patch_size=patch_size, heads=heads, dim_head=dim_head, pool=pool
    )

    assert y.shape == (B, dim), f"bad output shape {y.shape}"
    max_err = float(jnp.max(jnp.abs(y - ref)))
    assert jnp.allclose(y, ref, atol=2e-2, rtol=2e-2), f"max abs err {max_err}"

    print("KERNEL_OK")
</pallas_src>

<mosaic_0001>
module attributes {stable_mosaic.version = 11 : i64} {
  func.func @_patch_embed_kernel(%arg0: i32, %arg1: memref<1x16x64xf32, #tpu.memory_space<vmem>>, %arg2: memref<64x32xf32, #tpu.memory_space<vmem>>, %arg3: memref<1x32xf32, #tpu.memory_space<vmem>>, %arg4: memref<1x32xf32, #tpu.memory_space<vmem>>, %arg5: memref<1x17x32xf32, #tpu.memory_space<vmem>>, %arg6: memref<1x17x32xf32, #tpu.memory_space<vmem>>) attributes {dimension_semantics = [#tpu.dimension_semantics<parallel>], iteration_bounds = array<i64: 2>, scalar_prefetch = 0 : i64, scratch_operands = 0 : i64, tpu.core_type = #tpu.core_type<tc>, window_params = [{transform_indices = @transform_0, window_bounds = array<i64: 1, 16, 64>}, {pipeline_mode = #tpu.pipeline_mode<synchronous>, transform_indices = @transform_1, window_bounds = array<i64: 64, 32>}, {pipeline_mode = #tpu.pipeline_mode<synchronous>, transform_indices = @transform_2, window_bounds = array<i64: 1, 32>}, {pipeline_mode = #tpu.pipeline_mode<synchronous>, transform_indices = @transform_3, window_bounds = array<i64: 1, 32>}, {pipeline_mode = #tpu.pipeline_mode<synchronous>, transform_indices = @transform_4, window_bounds = array<i64: 1, 17, 32>}, {transform_indices = @transform_5, window_bounds = array<i64: 1, 17, 32>}]} {
    %c0 = arith.constant 0 : index
    %c0_0 = arith.constant 0 : index
    %c0_1 = arith.constant 0 : index
    %0 = vector.load %arg1[%c0, %c0_0, %c0_1] : memref<1x16x64xf32, #tpu.memory_space<vmem>>, vector<1x16x64xf32>
    %1 = vector.shape_cast %0 : vector<1x16x64xf32> to vector<16x64xf32>
    %c0_2 = arith.constant 0 : index
    %c0_3 = arith.constant 0 : index
    %2 = vector.load %arg2[%c0_2, %c0_3] : memref<64x32xf32, #tpu.memory_space<vmem>>, vector<64x32xf32>
    %cst = arith.constant dense<0.000000e+00> : vector<16x32xf32>
    %3 = tpu.matmul %1, %2, %cst {dimension_numbers = #tpu.dot_dimension_numbers<[1], [0], [0], [1], [0, 0, 1, 1], [], []>} : vector<16x64xf32>, vector<64x32xf32>, vector<16x32xf32> -> vector<16x32xf32>
    %c0_4 = arith.constant 0 : index
    %c0_5 = arith.constant 0 : index
    %4 = vector.load %arg3[%c0_4, %c0_5] : memref<1x32xf32, #tpu.memory_space<vmem>>, vector<1x32xf32>
    %5 = vector.broadcast %4 : vector<1x32xf32> to vector<16x32xf32>
    %6 = arith.addf %3, %5 : vector<16x32xf32>
    %c0_6 = arith.constant 0 : index
    %c0_7 = arith.constant 0 : index
    %7 = vector.load %arg4[%c0_6, %c0_7] : memref<1x32xf32, #tpu.memory_space<vmem>>, vector<1x32xf32>
    %8 = tpu.concatenate %7, %6 in 0 : vector<1x32xf32>, vector<16x32xf32> -> vector<17x32xf32>
    %c0_8 = arith.constant 0 : index
    %c0_9 = arith.constant 0 : index
    %c0_10 = arith.constant 0 : index
    %9 = vector.load %arg5[%c0_8, %c0_9, %c0_10] : memref<1x17x32xf32, #tpu.memory_space<vmem>>, vector<1x17x32xf32>
    %10 = vector.shape_cast %9 : vector<1x17x32xf32> to vector<17x32xf32>
    %11 = arith.addf %8, %10 : vector<17x32xf32>
    %c0_11 = arith.constant 0 : index
    %c0_12 = arith.constant 0 : index
    %c0_13 = arith.constant 0 : index
    %12 = vector.load %arg6[%c0_11, %c0_12, %c0_13] : memref<1x17x32xf32, #tpu.memory_space<vmem>>, vector<1x17x32xf32>
    %13 = vector.shape_cast %12 : vector<1x17x32xf32> to vector<17x32xf32>
    %14 = vector.shape_cast %11 : vector<17x32xf32> to vector<1x17x32xf32>
    tpu.vector_store %arg6[%c0_11, %c0_12, %c0_13], %14 {strides = array<i32>} : memref<1x17x32xf32, #tpu.memory_space<vmem>>, vector<1x17x32xf32>,
    return
  }
  func.func @transform_0(%arg0: i32) -> (i32, i32, i32) {
    %c0_i32 = arith.constant 0 : i32
    %c0_i32_0 = arith.constant 0 : i32
    %c0_i32_1 = arith.constant 0 : i32
    return %arg0, %c0_i32, %c0_i32_0 : i32, i32, i32
  }
  func.func @transform_1(%arg0: i32) -> (i32, i32) {
    %c0_i32 = arith.constant 0 : i32
    %c0_i32_0 = arith.constant 0 : i32
    %c0_i32_1 = arith.constant 0 : i32
    return %c0_i32, %c0_i32_0 : i32, i32
  }
  func.func @transform_2(%arg0: i32) -> (i32, i32) {
    %c0_i32 = arith.constant 0 : i32
    %c0_i32_0 = arith.constant 0 : i32
    %c0_i32_1 = arith.constant 0 : i32
    return %c0_i32, %c0_i32_0 : i32, i32
  }
  func.func @transform_3(%arg0: i32) -> (i32, i32) {
    %c0_i32 = arith.constant 0 : i32
    %c0_i32_0 = arith.constant 0 : i32
    %c0_i32_1 = arith.constant 0 : i32
    return %c0_i32, %c0_i32_0 : i32, i32
  }
  func.func @transform_4(%arg0: i32) -> (i32, i32, i32) {
    %c0_i32 = arith.constant 0 : i32
    %c0_i32_0 = arith.constant 0 : i32
    %c0_i32_1 = arith.constant 0 : i32
    %c0_i32_2 = arith.constant 0 : i32
    return %c0_i32, %c0_i32_0, %c0_i32_1 : i32, i32, i32
  }
  func.func @transform_5(%arg0: i32) -> (i32, i32, i32) {
    %c0_i32 = arith.constant 0 : i32
    %c0_i32_0 = arith.constant 0 : i32
    %c0_i32_1 = arith.constant 0 : i32
    return %arg0, %c0_i32, %c0_i32_0 : i32, i32, i32
  }
}

module attributes {stable_mosaic.version = 11 : i64} {
  func.func @kernel(%arg0: i32, %arg1: memref<24x32xf32, #tpu.memory_space<vmem>>, %arg2: memref<32x96xf32, #tpu.memory_space<vmem>>, %arg3: memref<1x32xf32, #tpu.memory_space<vmem>>, %arg4: memref<1x32xf32, #tpu.memory_space<vmem>>, %arg5: memref<24x96xf32, #tpu.memory_space<vmem>>) attributes {dimension_semantics = [#tpu.dimension_semantics<parallel>], iteration_bounds = array<i64: 2>, scalar_prefetch = 0 : i64, scratch_operands = 0 : i64, tpu.core_type = #tpu.core_type<tc>, window_params = [{transform_indices = @transform_0, window_bounds = array<i64: 24, 32>}, {pipeline_mode = #tpu.pipeline_mode<synchronous>, transform_indices = @transform_1, window_bounds = array<i64: 32, 96>}, {pipeline_mode = #tpu.pipeline_mode<synchronous>, transform_indices = @transform_2, window_bounds = array<i64: 1, 32>}, {pipeline_mode = #tpu.pipeline_mode<synchronous>, transform_indices = @transform_3, window_bounds = array<i64: 1, 32>}, {transform_indices = @transform_4, window_bounds = array<i64: 24, 96>}]} {
    %c0 = arith.constant 0 : index
    %c0_0 = arith.constant 0 : index
    %0 = vector.load %arg1[%c0, %c0_0] : memref<24x32xf32, #tpu.memory_space<vmem>>, vector<24x32xf32>
    %cst = arith.constant dense<0.000000e+00> : vector<24xf32>
    %1 = vector.multi_reduction <add>, %0, %cst [1] : vector<24x32xf32> to vector<24xf32>
    %2 = vector.shape_cast %1 : vector<24xf32> to vector<24x1xf32>
    %cst_1 = arith.constant 3.200000e+01 : f32
    %3 = vector.broadcast %cst_1 : f32 to vector<24x1xf32>
    %4 = arith.divf %2, %3 : vector<24x1xf32>
    %5 = vector.broadcast %4 : vector<24x1xf32> to vector<24x32xf32>
    %6 = arith.subf %0, %5 : vector<24x32xf32>
    %7 = arith.mulf %6, %6 : vector<24x32xf32>
    %cst_2 = arith.constant dense<0.000000e+00> : vector<24xf32>
    %8 = vector.multi_reduction <add>, %7, %cst_2 [1] : vector<24x32xf32> to vector<24xf32>
    %9 = vector.shape_cast %8 : vector<24xf32> to vector<24x1xf32>
    %cst_3 = arith.constant 3.200000e+01 : f32
    %10 = vector.broadcast %cst_3 : f32 to vector<24x1xf32>
    %11 = arith.divf %9, %10 : vector<24x1xf32>
    %12 = vector.broadcast %4 : vector<24x1xf32> to vector<24x32xf32>
    %13 = arith.subf %0, %12 : vector<24x32xf32>
    %cst_4 = arith.constant 9.99999974E-6 : f32
    %14 = vector.broadcast %cst_4 : f32 to vector<24x1xf32>
    %15 = arith.addf %11, %14 : vector<24x1xf32>
    %16 = math.rsqrt %15 : vector<24x1xf32>
    %17 = vector.broadcast %16 : vector<24x1xf32> to vector<24x32xf32>
    %18 = arith.mulf %13, %17 : vector<24x32xf32>
    %c0_5 = arith.constant 0 : index
    %c0_6 = arith.constant 0 : index
    %19 = vector.load %arg3[%c0_5, %c0_6] : memref<1x32xf32, #tpu.memory_space<vmem>>, vector<1x32xf32>
    %20 = vector.broadcast %19 : vector<1x32xf32> to vector<24x32xf32>
    %21 = arith.mulf %18, %20 : vector<24x32xf32>
    %c0_7 = arith.constant 0 : index
    %c0_8 = arith.constant 0 : index
    %22 = vector.load %arg4[%c0_7, %c0_8] : memref<1x32xf32, #tpu.memory_space<vmem>>, vector<1x32xf32>
    %23 = vector.broadcast %22 : vector<1x32xf32> to vector<24x32xf32>
    %24 = arith.addf %21, %23 : vector<24x32xf32>
    %c0_9 = arith.constant 0 : index
    %c0_10 = arith.constant 0 : index
    %25 = vector.load %arg2[%c0_9, %c0_10] : memref<32x96xf32, #tpu.memory_space<vmem>>, vector<32x96xf32>
    %cst_11 = arith.constant dense<0.000000e+00> : vector<24x96xf32>
    %26 = tpu.matmul %24, %25, %cst_11 {dimension_numbers = #tpu.dot_dimension_numbers<[1], [0], [0], [1], [0, 0, 1, 1], [], []>} : vector<24x32xf32>, vector<32x96xf32>, vector<24x96xf32> -> vector<24x96xf32>
    %c0_12 = arith.constant 0 : index
    %c0_13 = arith.constant 0 : index
    %27 = vector.load %arg5[%c0_12, %c0_13] : memref<24x96xf32, #tpu.memory_space<vmem>>, vector<24x96xf32>
    tpu.vector_store %arg5[%c0_12, %c0_13], %26 {strides = array<i32>} : memref<24x96xf32, #tpu.memory_space<vmem>>, vector<24x96xf32>,
    return
  }
  func.func @transform_0(%arg0: i32) -> (i32, i32) {
    %c0_i32 = arith.constant 0 : i32
    %c0_i32_0 = arith.constant 0 : i32
    return %arg0, %c0_i32 : i32, i32
  }
  func.func @transform_1(%arg0: i32) -> (i32, i32) {
    %c0_i32 = arith.constant 0 : i32
    %c0_i32_0 = arith.constant 0 : i32
    %c0_i32_1 = arith.constant 0 : i32
    return %c0_i32, %c0_i32_0 : i32, i32
  }
  func.func @transform_2(%arg0: i32) -> (i32, i32) {
    %c0_i32 = arith.constant 0 : i32
    %c0_i32_0 = arith.constant 0 : i32
    %c0_i32_1 = arith.constant 0 : i32
    return %c0_i32, %c0_i32_0 : i32, i32
  }
  func.func @transform_3(%arg0: i32) -> (i32, i32) {
    %c0_i32 = arith.constant 0 : i32
    %c0_i32_0 = arith.constant 0 : i32
    %c0_i32_1 = arith.constant 0 : i32
    return %c0_i32, %c0_i32_0 : i32, i32
  }
  func.func @transform_4(%arg0: i32) -> (i32, i32) {
    %c0_i32 = arith.constant 0 : i32
    %c0_i32_0 = arith.constant 0 : i32
    return %arg0, %c0_i32 : i32, i32
  }
}

module attributes {stable_mosaic.version = 11 : i64} {
  func.func @kernel(%arg0: i32, %arg1: memref<24x32xf32, #tpu.memory_space<vmem>>, %arg2: memref<32x32xf32, #tpu.memory_space<vmem>>, %arg3: memref<1x32xf32, #tpu.memory_space<vmem>>, %arg4: memref<24x32xf32, #tpu.memory_space<vmem>>, %arg5: memref<24x32xf32, #tpu.memory_space<vmem>>) attributes {dimension_semantics = [#tpu.dimension_semantics<parallel>], iteration_bounds = array<i64: 2>, scalar_prefetch = 0 : i64, scratch_operands = 0 : i64, tpu.core_type = #tpu.core_type<tc>, window_params = [{transform_indices = @transform_0, window_bounds = array<i64: 24, 32>}, {pipeline_mode = #tpu.pipeline_mode<synchronous>, transform_indices = @transform_1, window_bounds = array<i64: 32, 32>}, {pipeline_mode = #tpu.pipeline_mode<synchronous>, transform_indices = @transform_2, window_bounds = array<i64: 1, 32>}, {transform_indices = @transform_3, window_bounds = array<i64: 24, 32>}, {transform_indices = @transform_4, window_bounds = array<i64: 24, 32>}]} {
    %c0 = arith.constant 0 : index
    %c0_0 = arith.constant 0 : index
    %0 = vector.load %arg1[%c0, %c0_0] : memref<24x32xf32, #tpu.memory_space<vmem>>, vector<24x32xf32>
    %c0_1 = arith.constant 0 : index
    %c0_2 = arith.constant 0 : index
    %1 = vector.load %arg2[%c0_1, %c0_2] : memref<32x32xf32, #tpu.memory_space<vmem>>, vector<32x32xf32>
    %cst = arith.constant dense<0.000000e+00> : vector<24x32xf32>
    %2 = tpu.matmul %0, %1, %cst {dimension_numbers = #tpu.dot_dimension_numbers<[1], [0], [0], [1], [0, 0, 1, 1], [], []>} : vector<24x32xf32>, vector<32x32xf32>, vector<24x32xf32> -> vector<24x32xf32>
    %c0_3 = arith.constant 0 : index
    %c0_4 = arith.constant 0 : index
    %3 = vector.load %arg3[%c0_3, %c0_4] : memref<1x32xf32, #tpu.memory_space<vmem>>, vector<1x32xf32>
    %4 = vector.broadcast %3 : vector<1x32xf32> to vector<24x32xf32>
    %5 = arith.addf %2, %4 : vector<24x32xf32>
    %c0_5 = arith.constant 0 : index
    %c0_6 = arith.constant 0 : index
    %6 = vector.load %arg4[%c0_5, %c0_6] : memref<24x32xf32, #tpu.memory_space<vmem>>, vector<24x32xf32>
    %7 = arith.addf %5, %6 : vector<24x32xf32>
    %c0_7 = arith.constant 0 : index
    %c0_8 = arith.constant 0 : index
    %8 = vector.load %arg5[%c0_7, %c0_8] : memref<24x32xf32, #tpu.memory_space<vmem>>, vector<24x32xf32>
    tpu.vector_store %arg5[%c0_7, %c0_8], %7 {strides = array<i32>} : memref<24x32xf32, #tpu.memory_space<vmem>>, vector<24x32xf32>,
    return
  }
  func.func @transform_0(%arg0: i32) -> (i32, i32) {
    %c0_i32 = arith.constant 0 : i32
    %c0_i32_0 = arith.constant 0 : i32
    return %arg0, %c0_i32 : i32, i32
  }
  func.func @transform_1(%arg0: i32) -> (i32, i32) {
    %c0_i32 = arith.constant 0 : i32
    %c0_i32_0 = arith.constant 0 : i32
    %c0_i32_1 = arith.constant 0 : i32
    return %c0_i32, %c0_i32_0 : i32, i32
  }
  func.func @transform_2(%arg0: i32) -> (i32, i32) {
    %c0_i32 = arith.constant 0 : i32
    %c0_i32_0 = arith.constant 0 : i32
    %c0_i32_1 = arith.constant 0 : i32
    return %c0_i32, %c0_i32_0 : i32, i32
  }
  func.func @transform_3(%arg0: i32) -> (i32, i32) {
    %c0_i32 = arith.constant 0 : i32
    %c0_i32_0 = arith.constant 0 : i32
    return %arg0, %c0_i32 : i32, i32
  }
  func.func @transform_4(%arg0: i32) -> (i32, i32) {
    %c0_i32 = arith.constant 0 : i32
    %c0_i32_0 = arith.constant 0 : i32
    return %arg0, %c0_i32 : i32, i32
  }
}

module attributes {stable_mosaic.version = 11 : i64} {
  func.func @kernel(%arg0: i32, %arg1: memref<24x64xf32, #tpu.memory_space<vmem>>, %arg2: memref<64x32xf32, #tpu.memory_space<vmem>>, %arg3: memref<1x32xf32, #tpu.memory_space<vmem>>, %arg4: memref<24x32xf32, #tpu.memory_space<vmem>>, %arg5: memref<24x32xf32, #tpu.memory_space<vmem>>) attributes {dimension_semantics = [#tpu.dimension_semantics<parallel>], iteration_bounds = array<i64: 2>, scalar_prefetch = 0 : i64, scratch_operands = 0 : i64, tpu.core_type = #tpu.core_type<tc>, window_params = [{transform_indices = @transform_0, window_bounds = array<i64: 24, 64>}, {pipeline_mode = #tpu.pipeline_mode<synchronous>, transform_indices = @transform_1, window_bounds = array<i64: 64, 32>}, {pipeline_mode = #tpu.pipeline_mode<synchronous>, transform_indices = @transform_2, window_bounds = array<i64: 1, 32>}, {transform_indices = @transform_3, window_bounds = array<i64: 24, 32>}, {transform_indices = @transform_4, window_bounds = array<i64: 24, 32>}]} {
    %c0 = arith.constant 0 : index
    %c0_0 = arith.constant 0 : index
    %0 = vector.load %arg1[%c0, %c0_0] : memref<24x64xf32, #tpu.memory_space<vmem>>, vector<24x64xf32>
    %c0_1 = arith.constant 0 : index
    %c0_2 = arith.constant 0 : index
    %1 = vector.load %arg2[%c0_1, %c0_2] : memref<64x32xf32, #tpu.memory_space<vmem>>, vector<64x32xf32>
    %cst = arith.constant dense<0.000000e+00> : vector<24x32xf32>
    %2 = tpu.matmul %0, %1, %cst {dimension_numbers = #tpu.dot_dimension_numbers<[1], [0], [0], [1], [0, 0, 1, 1], [], []>} : vector<24x64xf32>, vector<64x32xf32>, vector<24x32xf32> -> vector<24x32xf32>
    %c0_3 = arith.constant 0 : index
    %c0_4 = arith.constant 0 : index
    %3 = vector.load %arg3[%c0_3, %c0_4] : memref<1x32xf32, #tpu.memory_space<vmem>>, vector<1x32xf32>
    %4 = vector.broadcast %3 : vector<1x32xf32> to vector<24x32xf32>
    %5 = arith.addf %2, %4 : vector<24x32xf32>
    %c0_5 = arith.constant 0 : index
    %c0_6 = arith.constant 0 : index
    %6 = vector.load %arg4[%c0_5, %c0_6] : memref<24x32xf32, #tpu.memory_space<vmem>>, vector<24x32xf32>
    %7 = arith.addf %5, %6 : vector<24x32xf32>
    %c0_7 = arith.constant 0 : index
    %c0_8 = arith.constant 0 : index
    %8 = vector.load %arg5[%c0_7, %c0_8] : memref<24x32xf32, #tpu.memory_space<vmem>>, vector<24x32xf32>
    tpu.vector_store %arg5[%c0_7, %c0_8], %7 {strides = array<i32>} : memref<24x32xf32, #tpu.memory_space<vmem>>, vector<24x32xf32>,
    return
  }
  func.func @transform_0(%arg0: i32) -> (i32, i32) {
    %c0_i32 = arith.constant 0 : i32
    %c0_i32_0 = arith.constant 0 : i32
    return %arg0, %c0_i32 : i32, i32
  }
  func.func @transform_1(%arg0: i32) -> (i32, i32) {
    %c0_i32 = arith.constant 0 : i32
    %c0_i32_0 = arith.constant 0 : i32
    %c0_i32_1 = arith.constant 0 : i32
    return %c0_i32, %c0_i32_0 : i32, i32
  }
  func.func @transform_2(%arg0: i32) -> (i32, i32) {
    %c0_i32 = arith.constant 0 : i32
    %c0_i32_0 = arith.constant 0 : i32
    %c0_i32_1 = arith.constant 0 : i32
    return %c0_i32, %c0_i32_0 : i32, i32
  }
  func.func @transform_3(%arg0: i32) -> (i32, i32) {
    %c0_i32 = arith.constant 0 : i32
    %c0_i32_0 = arith.constant 0 : i32
    return %arg0, %c0_i32 : i32, i32
  }
  func.func @transform_4(%arg0: i32) -> (i32, i32) {
    %c0_i32 = arith.constant 0 : i32
    %c0_i32_0 = arith.constant 0 : i32
    return %arg0, %c0_i32 : i32, i32
  }
}

module attributes {stable_mosaic.version = 11 : i64} {
  func.func @kernel(%arg0: i32, %arg1: memref<24x32xf32, #tpu.memory_space<vmem>>, %arg2: memref<32x64xf32, #tpu.memory_space<vmem>>, %arg3: memref<1x32xf32, #tpu.memory_space<vmem>>, %arg4: memref<1x32xf32, #tpu.memory_space<vmem>>, %arg5: memref<1x64xf32, #tpu.memory_space<vmem>>, %arg6: memref<24x64xf32, #tpu.memory_space<vmem>>) attributes {dimension_semantics = [#tpu.dimension_semantics<parallel>], iteration_bounds = array<i64: 2>, scalar_prefetch = 0 : i64, scratch_operands = 0 : i64, tpu.core_type = #tpu.core_type<tc>, window_params = [{transform_indices = @transform_0, window_bounds = array<i64: 24, 32>}, {pipeline_mode = #tpu.pipeline_mode<synchronous>, transform_indices = @transform_1, window_bounds = array<i64: 32, 64>}, {pipeline_mode = #tpu.pipeline_mode<synchronous>, transform_indices = @transform_2, window_bounds = array<i64: 1, 32>}, {pipeline_mode = #tpu.pipeline_mode<synchronous>, transform_indices = @transform_3, window_bounds = array<i64: 1, 32>}, {pipeline_mode = #tpu.pipeline_mode<synchronous>, transform_indices = @transform_4, window_bounds = array<i64: 1, 64>}, {transform_indices = @transform_5, window_bounds = array<i64: 24, 64>}]} {
    %c0 = arith.constant 0 : index
    %c0_0 = arith.constant 0 : index
    %0 = vector.load %arg1[%c0, %c0_0] : memref<24x32xf32, #tpu.memory_space<vmem>>, vector<24x32xf32>
    %cst = arith.constant dense<0.000000e+00> : vector<24xf32>
    %1 = vector.multi_reduction <add>, %0, %cst [1] : vector<24x32xf32> to vector<24xf32>
    %2 = vector.shape_cast %1 : vector<24xf32> to vector<24x1xf32>
    %cst_1 = arith.constant 3.200000e+01 : f32
    %3 = vector.broadcast %cst_1 : f32 to vector<24x1xf32>
    %4 = arith.divf %2, %3 : vector<24x1xf32>
    %5 = vector.broadcast %4 : vector<24x1xf32> to vector<24x32xf32>
    %6 = arith.subf %0, %5 : vector<24x32xf32>
    %7 = arith.mulf %6, %6 : vector<24x32xf32>
    %cst_2 = arith.constant dense<0.000000e+00> : vector<24xf32>
    %8 = vector.multi_reduction <add>, %7, %cst_2 [1] : vector<24x32xf32> to vector<24xf32>
    %9 = vector.shape_cast %8 : vector<24xf32> to vector<24x1xf32>
    %cst_3 = arith.constant 3.200000e+01 : f32
    %10 = vector.broadcast %cst_3 : f32 to vector<24x1xf32>
    %11 = arith.divf %9, %10 : vector<24x1xf32>
    %12 = vector.broadcast %4 : vector<24x1xf32> to vector<24x32xf32>
    %13 = arith.subf %0, %12 : vector<24x32xf32>
    %cst_4 = arith.constant 9.99999974E-6 : f32
    %14 = vector.broadcast %cst_4 : f32 to vector<24x1xf32>
    %15 = arith.addf %11, %14 : vector<24x1xf32>
    %16 = math.rsqrt %15 : vector<24x1xf32>
    %17 = vector.broadcast %16 : vector<24x1xf32> to vector<24x32xf32>
    %18 = arith.mulf %13, %17 : vector<24x32xf32>
    %c0_5 = arith.constant 0 : index
    %c0_6 = arith.constant 0 : index
    %19 = vector.load %arg3[%c0_5, %c0_6] : memref<1x32xf32, #tpu.memory_space<vmem>>, vector<1x32xf32>
    %20 = vector.broadcast %19 : vector<1x32xf32> to vector<24x32xf32>
    %21 = arith.mulf %18, %20 : vector<24x32xf32>
    %c0_7 = arith.constant 0 : index
    %c0_8 = arith.constant 0 : index
    %22 = vector.load %arg4[%c0_7, %c0_8] : memref<1x32xf32, #tpu.memory_space<vmem>>, vector<1x32xf32>
    %23 = vector.broadcast %22 : vector<1x32xf32> to vector<24x32xf32>
    %24 = arith.addf %21, %23 : vector<24x32xf32>
    %c0_9 = arith.constant 0 : index
    %c0_10 = arith.constant 0 : index
    %25 = vector.load %arg2[%c0_9, %c0_10] : memref<32x64xf32, #tpu.memory_space<vmem>>, vector<32x64xf32>
    %cst_11 = arith.constant dense<0.000000e+00> : vector<24x64xf32>
    %26 = tpu.matmul %24, %25, %cst_11 {dimension_numbers = #tpu.dot_dimension_numbers<[1], [0], [0], [1], [0, 0, 1, 1], [], []>} : vector<24x32xf32>, vector<32x64xf32>, vector<24x64xf32> -> vector<24x64xf32>
    %c0_12 = arith.constant 0 : index
    %c0_13 = arith.constant 0 : index
    %27 = vector.load %arg5[%c0_12, %c0_13] : memref<1x64xf32, #tpu.memory_space<vmem>>, vector<1x64xf32>
    %28 = vector.broadcast %27 : vector<1x64xf32> to vector<24x64xf32>
    %29 = arith.addf %26, %28 : vector<24x64xf32>
    %30 = arith.mulf %29, %29 : vector<24x64xf32>
    %31 = arith.mulf %29, %30 : vector<24x64xf32>
    %cst_14 = arith.constant 4.471500e-02 : f32
    %32 = vector.broadcast %cst_14 : f32 to vector<24x64xf32>
    %33 = arith.mulf %32, %31 : vector<24x64xf32>
    %34 = arith.addf %29, %33 : vector<24x64xf32>
    %cst_15 = arith.constant 0.797884583 : f32
    %35 = vector.broadcast %cst_15 : f32 to vector<24x64xf32>
    %36 = arith.mulf %35, %34 : vector<24x64xf32>
    %37 = math.tanh %36 : vector<24x64xf32>
    %cst_16 = arith.constant 1.000000e+00 : f32
    %38 = vector.broadcast %cst_16 : f32 to vector<24x64xf32>
    %39 = arith.addf %38, %37 : vector<24x64xf32>
    %cst_17 = arith.constant 5.000000e-01 : f32
    %40 = vector.broadcast %cst_17 : f32 to vector<24x64xf32>
    %41 = arith.mulf %40, %39 : vector<24x64xf32>
    %42 = arith.mulf %29, %41 : vector<24x64xf32>
    %c0_18 = arith.constant 0 : index
    %c0_19 = arith.constant 0 : index
    %43 = vector.load %arg6[%c0_18, %c0_19] : memref<24x64xf32, #tpu.memory_space<vmem>>, vector<24x64xf32>
    tpu.vector_store %arg6[%c0_18, %c0_19], %42 {strides = array<i32>} : memref<24x64xf32, #tpu.memory_space<vmem>>, vector<24x64xf32>,
    return
  }
  func.func @transform_0(%arg0: i32) -> (i32, i32) {
    %c0_i32 = arith.constant 0 : i32
    %c0_i32_0 = arith.constant 0 : i32
    return %arg0, %c0_i32 : i32, i32
  }
  func.func @transform_1(%arg0: i32) -> (i32, i32) {
    %c0_i32 = arith.constant 0 : i32
    %c0_i32_0 = arith.constant 0 : i32
    %c0_i32_1 = arith.constant 0 : i32
    return %c0_i32, %c0_i32_0 : i32, i32
  }
  func.func @transform_2(%arg0: i32) -> (i32, i32) {
    %c0_i32 = arith.constant 0 : i32
    %c0_i32_0 = arith.constant 0 : i32
    %c0_i32_1 = arith.constant 0 : i32
    return %c0_i32, %c0_i32_0 : i32, i32
  }
  func.func @transform_3(%arg0: i32) -> (i32, i32) {
    %c0_i32 = arith.constant 0 : i32
    %c0_i32_0 = arith.constant 0 : i32
    %c0_i32_1 = arith.constant 0 : i32
    return %c0_i32, %c0_i32_0 : i32, i32
  }
  func.func @transform_4(%arg0: i32) -> (i32, i32) {
    %c0_i32 = arith.constant 0 : i32
    %c0_i32_0 = arith.constant 0 : i32
    %c0_i32_1 = arith.constant 0 : i32
    return %c0_i32, %c0_i32_0 : i32, i32
  }
  func.func @transform_5(%arg0: i32) -> (i32, i32) {
    %c0_i32 = arith.constant 0 : i32
    %c0_i32_0 = arith.constant 0 : i32
    return %arg0, %c0_i32 : i32, i32
  }
}

module attributes {stable_mosaic.version = 11 : i64} {
  func.func @_attention_kernel(%arg0: i32, %arg1: memref<1x17x96xf32, #tpu.memory_space<vmem>>, %arg2: memref<1x17x32xf32, #tpu.memory_space<vmem>>) attributes {dimension_semantics = [#tpu.dimension_semantics<parallel>], iteration_bounds = array<i64: 2>, scalar_prefetch = 0 : i64, scratch_operands = 0 : i64, tpu.core_type = #tpu.core_type<tc>, window_params = [{transform_indices = @transform_0, window_bounds = array<i64: 1, 17, 96>}, {transform_indices = @transform_1, window_bounds = array<i64: 1, 17, 32>}]} {
    %c0 = arith.constant 0 : index
    %c0_0 = arith.constant 0 : index
    %c0_1 = arith.constant 0 : index
    %0 = vector.load %arg1[%c0, %c0_0, %c0_1] : memref<1x17x96xf32, #tpu.memory_space<vmem>>, vector<1x17x96xf32>
    %1 = vector.shape_cast %0 : vector<1x17x96xf32> to vector<17x96xf32>
    %2 = vector.extract_strided_slice %1 {offsets = [0, 0], sizes = [17, 8], strides = [1, 1]} : vector<17x96xf32> to vector<17x8xf32>
    %3 = vector.extract_strided_slice %1 {offsets = [0, 32], sizes = [17, 8], strides = [1, 1]} : vector<17x96xf32> to vector<17x8xf32>
    %4 = vector.extract_strided_slice %1 {offsets = [0, 64], sizes = [17, 8], strides = [1, 1]} : vector<17x96xf32> to vector<17x8xf32>
    %5 = tpu.transpose %3, [1, 0] : vector<17x8xf32> -> vector<8x17xf32>
    %cst = arith.constant dense<0.000000e+00> : vector<17x17xf32>
    %6 = tpu.matmul %2, %5, %cst {dimension_numbers = #tpu.dot_dimension_numbers<[1], [0], [0], [1], [0, 0, 1, 1], [], []>} : vector<17x8xf32>, vector<8x17xf32>, vector<17x17xf32> -> vector<17x17xf32>
    %cst_2 = arith.constant 0.353553385 : f32
    %7 = vector.broadcast %cst_2 : f32 to vector<17x17xf32>
    %8 = arith.mulf %6, %7 : vector<17x17xf32>
    %cst_3 = arith.constant dense<0xFF800000> : vector<17xf32>
    %9 = vector.multi_reduction <maximumf>, %8, %cst_3 [1] : vector<17x17xf32> to vector<17xf32>
    %10 = vector.shape_cast %9 : vector<17xf32> to vector<17x1xf32>
    %11 = vector.broadcast %10 : vector<17x1xf32> to vector<17x17xf32>
    %12 = arith.subf %8, %11 : vector<17x17xf32>
    %13 = math.exp %12 : vector<17x17xf32>
    %cst_4 = arith.constant dense<0.000000e+00> : vector<17xf32>
    %14 = vector.multi_reduction <add>, %13, %cst_4 [1] : vector<17x17xf32> to vector<17xf32>
    %15 = vector.shape_cast %14 : vector<17xf32> to vector<17x1xf32>
    %16 = tpu.reciprocal %15 {approx = true} : vector<17x1xf32> -> vector<17x1xf32>
    %17 = vector.broadcast %16 : vector<17x1xf32> to vector<17x17xf32>
    %18 = arith.mulf %13, %17 : vector<17x17xf32>
    %cst_5 = arith.constant dense<0.000000e+00> : vector<17x8xf32>
    %19 = tpu.matmul %18, %4, %cst_5 {dimension_numbers = #tpu.dot_dimension_numbers<[1], [0], [0], [1], [0, 0, 1, 1], [], []>} : vector<17x17xf32>, vector<17x8xf32>, vector<17x8xf32> -> vector<17x8xf32>
    %20 = vector.extract_strided_slice %1 {offsets = [0, 8], sizes = [17, 8], strides = [1, 1]} : vector<17x96xf32> to vector<17x8xf32>
    %21 = vector.extract_strided_slice %1 {offsets = [0, 40], sizes = [17, 8], strides = [1, 1]} : vector<17x96xf32> to vector<17x8xf32>
    %22 = vector.extract_strided_slice %1 {offsets = [0, 72], sizes = [17, 8], strides = [1, 1]} : vector<17x96xf32> to vector<17x8xf32>
    %23 = tpu.transpose %21, [1, 0] : vector<17x8xf32> -> vector<8x17xf32>
    %cst_6 = arith.constant dense<0.000000e+00> : vector<17x17xf32>
    %24 = tpu.matmul %20, %23, %cst_6 {dimension_numbers = #tpu.dot_dimension_numbers<[1], [0], [0], [1], [0, 0, 1, 1], [], []>} : vector<17x8xf32>, vector<8x17xf32>, vector<17x17xf32> -> vector<17x17xf32>
    %cst_7 = arith.constant 0.353553385 : f32
    %25 = vector.broadcast %cst_7 : f32 to vector<17x17xf32>
    %26 = arith.mulf %24, %25 : vector<17x17xf32>
    %cst_8 = arith.constant dense<0xFF800000> : vector<17xf32>
    %27 = vector.multi_reduction <maximumf>, %26, %cst_8 [1] : vector<17x17xf32> to vector<17xf32>
    %28 = vector.shape_cast %27 : vector<17xf32> to vector<17x1xf32>
    %29 = vector.broadcast %28 : vector<17x1xf32> to vector<17x17xf32>
    %30 = arith.subf %26, %29 : vector<17x17xf32>
    %31 = math.exp %30 : vector<17x17xf32>
    %cst_9 = arith.constant dense<0.000000e+00> : vector<17xf32>
    %32 = vector.multi_reduction <add>, %31, %cst_9 [1] : vector<17x17xf32> to vector<17xf32>
    %33 = vector.shape_cast %32 : vector<17xf32> to vector<17x1xf32>
    %34 = tpu.reciprocal %33 {approx = true} : vector<17x1xf32> -> vector<17x1xf32>
    %35 = vector.broadcast %34 : vector<17x1xf32> to vector<17x17xf32>
    %36 = arith.mulf %31, %35 : vector<17x17xf32>
    %cst_10 = arith.constant dense<0.000000e+00> : vector<17x8xf32>
    %37 = tpu.matmul %36, %22, %cst_10 {dimension_numbers = #tpu.dot_dimension_numbers<[1], [0], [0], [1], [0, 0, 1, 1], [], []>} : vector<17x17xf32>, vector<17x8xf32>, vector<17x8xf32> -> vector<17x8xf32>
    %38 = vector.extract_strided_slice %1 {offsets = [0, 16], sizes = [17, 8], strides = [1, 1]} : vector<17x96xf32> to vector<17x8xf32>
    %39 = vector.extract_strided_slice %1 {offsets = [0, 48], sizes = [17, 8], strides = [1, 1]} : vector<17x96xf32> to vector<17x8xf32>
    %40 = vector.extract_strided_slice %1 {offsets = [0, 80], sizes = [17, 8], strides = [1, 1]} : vector<17x96xf32> to vector<17x8xf32>
    %41 = tpu.transpose %39, [1, 0] : vector<17x8xf32> -> vector<8x17xf32>
    %cst_11 = arith.constant dense<0.000000e+00> : vector<17x17xf32>
    %42 = tpu.matmul %38, %41, %cst_11 {dimension_numbers = #tpu.dot_dimension_numbers<[1], [0], [0], [1], [0, 0, 1, 1], [], []>} : vector<17x8xf32>, vector<8x17xf32>, vector<17x17xf32> -> vector<17x17xf32>
    %cst_12 = arith.constant 0.353553385 : f32
    %43 = vector.broadcast %cst_12 : f32 to vector<17x17xf32>
    %44 = arith.mulf %42, %43 : vector<17x17xf32>
    %cst_13 = arith.constant dense<0xFF800000> : vector<17xf32>
    %45 = vector.multi_reduction <maximumf>, %44, %cst_13 [1] : vector<17x17xf32> to vector<17xf32>
    %46 = vector.shape_cast %45 : vector<17xf32> to vector<17x1xf32>
    %47 = vector.broadcast %46 : vector<17x1xf32> to vector<17x17xf32>
    %48 = arith.subf %44, %47 : vector<17x17xf32>
    %49 = math.exp %48 : vector<17x17xf32>
    %cst_14 = arith.constant dense<0.000000e+00> : vector<17xf32>
    %50 = vector.multi_reduction <add>, %49, %cst_14 [1] : vector<17x17xf32> to vector<17xf32>
    %51 = vector.shape_cast %50 : vector<17xf32> to vector<17x1xf32>
    %52 = tpu.reciprocal %51 {approx = true} : vector<17x1xf32> -> vector<17x1xf32>
    %53 = vector.broadcast %52 : vector<17x1xf32> to vector<17x17xf32>
    %54 = arith.mulf %49, %53 : vector<17x17xf32>
    %cst_15 = arith.constant dense<0.000000e+00> : vector<17x8xf32>
    %55 = tpu.matmul %54, %40, %cst_15 {dimension_numbers = #tpu.dot_dimension_numbers<[1], [0], [0], [1], [0, 0, 1, 1], [], []>} : vector<17x17xf32>, vector<17x8xf32>, vector<17x8xf32> -> vector<17x8xf32>
    %56 = vector.extract_strided_slice %1 {offsets = [0, 24], sizes = [17, 8], strides = [1, 1]} : vector<17x96xf32> to vector<17x8xf32>
    %57 = vector.extract_strided_slice %1 {offsets = [0, 56], sizes = [17, 8], strides = [1, 1]} : vector<17x96xf32> to vector<17x8xf32>
    %58 = vector.extract_strided_slice %1 {offsets = [0, 88], sizes = [17, 8], strides = [1, 1]} : vector<17x96xf32> to vector<17x8xf32>
    %59 = tpu.transpose %57, [1, 0] : vector<17x8xf32> -> vector<8x17xf32>
    %cst_16 = arith.constant dense<0.000000e+00> : vector<17x17xf32>
    %60 = tpu.matmul %56, %59, %cst_16 {dimension_numbers = #tpu.dot_dimension_numbers<[1], [0], [0], [1], [0, 0, 1, 1], [], []>} : vector<17x8xf32>, vector<8x17xf32>, vector<17x17xf32> -> vector<17x17xf32>
    %cst_17 = arith.constant 0.353553385 : f32
    %61 = vector.broadcast %cst_17 : f32 to vector<17x17xf32>
    %62 = arith.mulf %60, %61 : vector<17x17xf32>
    %cst_18 = arith.constant dense<0xFF800000> : vector<17xf32>
    %63 = vector.multi_reduction <maximumf>, %62, %cst_18 [1] : vector<17x17xf32> to vector<17xf32>
    %64 = vector.shape_cast %63 : vector<17xf32> to vector<17x1xf32>
    %65 = vector.broadcast %64 : vector<17x1xf32> to vector<17x17xf32>
    %66 = arith.subf %62, %65 : vector<17x17xf32>
    %67 = math.exp %66 : vector<17x17xf32>
    %cst_19 = arith.constant dense<0.000000e+00> : vector<17xf32>
    %68 = vector.multi_reduction <add>, %67, %cst_19 [1] : vector<17x17xf32> to vector<17xf32>
    %69 = vector.shape_cast %68 : vector<17xf32> to vector<17x1xf32>
    %70 = tpu.reciprocal %69 {approx = true} : vector<17x1xf32> -> vector<17x1xf32>
    %71 = vector.broadcast %70 : vector<17x1xf32> to vector<17x17xf32>
    %72 = arith.mulf %67, %71 : vector<17x17xf32>
    %cst_20 = arith.constant dense<0.000000e+00> : vector<17x8xf32>
    %73 = tpu.matmul %72, %58, %cst_20 {dimension_numbers = #tpu.dot_dimension_numbers<[1], [0], [0], [1], [0, 0, 1, 1], [], []>} : vector<17x17xf32>, vector<17x8xf32>, vector<17x8xf32> -> vector<17x8xf32>
    %74 = tpu.concatenate %19, %37, %55, %73 in 1 : vector<17x8xf32>, vector<17x8xf32>, vector<17x8xf32>, vector<17x8xf32> -> vector<17x32xf32>
    %c0_21 = arith.constant 0 : index
    %c0_22 = arith.constant 0 : index
    %c0_23 = arith.constant 0 : index
    %75 = vector.load %arg2[%c0_21, %c0_22, %c0_23] : memref<1x17x32xf32, #tpu.memory_space<vmem>>, vector<1x17x32xf32>
    %76 = vector.shape_cast %75 : vector<1x17x32xf32> to vector<17x32xf32>
    %77 = vector.shape_cast %74 : vector<17x32xf32> to vector<1x17x32xf32>
    tpu.vector_store %arg2[%c0_21, %c0_22, %c0_23], %77 {strides = array<i32>} : memref<1x17x32xf32, #tpu.memory_space<vmem>>, vector<1x17x32xf32>,
    return
  }
  func.func @transform_0(%arg0: i32) -> (i32, i32, i32) {
    %c0_i32 = arith.constant 0 : i32
    %c0_i32_0 = arith.constant 0 : i32
    %c0_i32_1 = arith.constant 0 : i32
    return %arg0, %c0_i32, %c0_i32_0 : i32, i32, i32
  }
  func.func @transform_1(%arg0: i32) -> (i32, i32, i32) {
    %c0_i32 = arith.constant 0 : i32
    %c0_i32_0 = arith.constant 0 : i32
    %c0_i32_1 = arith.constant 0 : i32
    return %arg0, %c0_i32, %c0_i32_0 : i32, i32, i32
  }
}

</mosaic_0001>

<bundles_post_ra>
// kernel: vit_forward.11
= control target key start
LH: loop header
LB: loop body
LE: loop exit
PB: predicated region body
PF: predicated region fallthrough
CT: control target
= control target key end

     0   :  { %s491_s18 = smov 0   ;;  %s553_s0 = inlined_call_operand.vmem [shape: f32[2,16,64], index: 0, kind: input, shape index: {}]   ;;  %s554_s1 = inlined_call_operand.vmem [shape: f32[64,32], index: 1, kind: input, shape index: {}]   ;;  %s555_s2 = inlined_call_operand.vmem [shape: f32[1,32], index: 2, kind: input, shape index: {}]   ;;  %s556_s3 = inlined_call_operand.vmem [shape: f32[1,32], index: 3, kind: input, shape index: {}]   ;;  %s557_s4 = inlined_call_operand.vmem [shape: f32[1,17,32], index: 4, kind: input, shape index: {}]   ;;  %s558_s5 = inlined_call_operand.vmem [shape: f32[2,17,32], index: 5, kind: output, shape index: {}]  }
   0x1 LB: > { %s401_s19 = sadd.s32 4294967295, %s459_s18   ;;  %p405_p0 = scmp.ge.s32.totalorder %s459_s18, 1  ;;  %s459_s18 = sphi %s491_s18, %s15_s18  }
   0x2   : > { %p187_p1 = scmp.lt.s32.totalorder %s459_s18, 3 }
   0x4   : > { %p188_p2 = pnand %p405_p0, %p187_p1 }
   0x5   : > { %p215_p3 = scmp.lt.s32.totalorder (!%p188_p2), %s401_s19, 1 }
   0x6   : > { %191 = sbr.rel (%p188_p2) target bundleno = 231 (0xe7), region = 40 }
   0xb   : > { %v234_v0 = vld [vmem:[%s554_s1 + $0x38] sm:$0xff]  ;;  %v233_v1 = vld [vmem:[%s554_s1 + $0x30] sm:$0xff]  ;;  %v232_v2 = vld [vmem:[%s554_s1 + $0x28] sm:$0xff]  ;;  %s560_s19 = smov (!%p215_p3, %s401_s19), 1  ;;  %vm242_vm0 = vcmask 523264   ;;  %vm344_vm1 = vcmask 253952  }
   0xc   : > { %425 = vmatprep.subr.mxu0 %v234_v0  ;;  %v231_v3 = vld [vmem:[%s554_s1 + $0x20] sm:$0xff]  ;;  %s414_s28 = sshll.u32 %s560_s19, 4  ;;  %v230_v4 = vld [vmem:[%s554_s1 + $0x18] sm:$0xff]  ;;  %v229_v6 = vld [vmem:[%s554_s1 + $0x10] sm:$0xff]  ;;  %s444_s17 = smul.u32 24, %s560_s19  ;;  %vm327_vm2 = vcmask 1040384  }
   0xd   : > { %426 = vmatpush3.msra.mxu0 %v234_v0  ;;  %s219_s6 = scalar_lea.vmem %s553_s0, %s414_s28  ;;  %v228_v7 = vld [vmem:[%s554_s1 + $0x8] sm:$0xff]  ;;  %v227_v8 = vld [vmem:[%s554_s1] sm:$0xff]  ;;  %v337_v13 = vld [vmem:[%s557_s4 + $0x10] sm:$0x1]  ;;  %vm341_vm3 = vcmask 261120  }
   0xe   : > { %427 = vmatprep.subr.mxu0 %v233_v1  ;;  %v225_v5 = vld [vmem:[%s219_s6] sm:$0xff]  ;;  %v226_v9 = vld [vmem:[%s219_s6 + $0x8] sm:$0xff]  ;;  %s224_s24 = scalar_lea.vmem %s558_s5, %s444_s17 }
   0xf   : > { %428 = vmatpush3.msra.mxu0 %v233_v1  ;;  %441 = vmatprep.mubr.msk.f32.mxu0 %vm242_vm0, %v225_v5  ;;  %v409_v10 = vld [vmem:[%s555_s2] ss:$0 sm:$0xff]  ;;  %v336_v21 = vld [vmem:[%s557_s4 + $0x8] sm:$0xff] }
  0x10   : > { %429 = vmatprep.subr.mxu0 %v232_v2  ;;  %v324_v17 = vld [vmem:[%s556_s3] sm:$0x1] }
  0x11   : > { %430 = vmatpush3.msra.mxu0 %v232_v2  ;;  %v335_v20 = vld [vmem:[%s557_s4] sm:$0xff] }
  0x12   : > { %431 = vmatprep.subr.mxu0 %v231_v3 }
  0x13   : > { %432 = vmatpush3.msra.mxu0 %v231_v3 }
  0x14   : > { %433 = vmatprep.subr.mxu0 %v230_v4 }
  0x15   : > { %434 = vmatpush3.msra.mxu0 %v230_v4 }
  0x16   : > { %435 = vmatprep.subr.mxu0 %v229_v6 }
  0x17   : > { %436 = vmatpush3.msra.mxu0 %v229_v6 }
  0x18   : > { %437 = vmatprep.subr.mxu0 %v228_v7 }
  0x19   : > { %438 = vmatpush3.msra.mxu0 %v228_v7 }
  0x1a   : > { %439 = vmatprep.subr.mxu0 %v227_v8 }
  0x1b   : > { %440 = vmatpush3.msra.mxu0 %v227_v8 }
  0x1c   : > { %442 = vmatmul.mubr.msk.f32.vlgmr.msra.gmra.mxu0 %vm242_vm0, %v226_v9 }
  0xdc   : > { %v443_v11 = vpop.f32.mrf.mxu0 }
  0xdd   : > { %v321_v12 = vadd.f32 %v443_v11, %v409_v10 }
  0xde   : > { %v315_v14 = vpop.f32.mrf.mxu0 }
  0xdf   : > { %v329_v15 = vrot.slane %v321_v12, 7  ;;  %v316_v16 = vadd.f32 %v409_v10, %v315_v14 }
  0xe1   : > { %v340_v18 = vadd.f32 %v337_v13, %v329_v15  ;;  %v328_v19 = vrot.slane %v316_v16, 7 }
  0xe3   : > { %345 = vst.msk [vmem:[%s224_s24 + $0x10] sm:$0x1] %vm344_vm1, %v340_v18  ;;  %v330_v22 = vsel %vm327_vm2, %v328_v19, %v329_v15  ;;  %v334_v23 = vsel %vm327_vm2, %v324_v17, %v328_v19 }
  0xe4   : > { %v338_v24 = vadd.f32 %v335_v20, %v334_v23  ;;  %v339_v25 = vadd.f32 %v336_v21, %v330_v22 }
  0xe6   : > { %342 = vst.msk [vmem:[%s224_s24] sm:$0xff] %vm341_vm3, %v338_v24  ;;  %343 = vst.msk [vmem:[%s224_s24 + $0x8] sm:$0xff] %vm341_vm3, %v339_v25 }
  0xe7 PF: > { %s15_s18 = sadd.s32 1, %s459_s18  }
  0xe8   : > { %p12_p4 = scmp.ge.s32.totalorder %s15_s18, 4  }
  0xea   :  { %14 = sbr.rel (!%p12_p4) target bundleno = 1 (0x1), region = 70 }

// kernel: vit_forward.12
= control target key start
LH: loop header
LB: loop body
LE: loop exit
PB: predicated region body
PF: predicated region fallthrough
CT: control target
= control target key end

     0   :  { %s878_s15 = smov 0   ;;  %s880_s16 = smov 0   ;;  %s987_s0 = inlined_call_operand.vmem [shape: f32[34,32], index: 0, kind: input, shape index: {}]   ;;  %s988_s1 = inlined_call_operand.vmem [shape: f32[32,96], index: 1, kind: input, shape index: {}]   ;;  %s989_s2 = inlined_call_operand.vmem [shape: f32[1,32], index: 2, kind: input, shape index: {}]   ;;  %s990_s3 = inlined_call_operand.vmem [shape: f32[1,32], index: 3, kind: input, shape index: {}]   ;;  %s991_s4 = inlined_call_operand.vmem [shape: f32[34,96], index: 4, kind: output, shape index: {}]  }
   0x1   :  { %s882_s17 = smov 0  }
   0x2 LB: > { %s891_s18 = sadd.s32 4294967295, %s817_s17   ;;  %s893_s19 = sadd.s32 1, %s817_s17   ;;  %s817_s17 = sphi %s882_s17, %s995_s17   ;;  %s813_s16 = sphi %s880_s16, %s994_s16   ;;  %s809_s15 = sphi %s878_s15, %s993_s15  }
   0x3   : > { %s107_s20 = ssub.s32 %s817_s17, %s893_s19  ;;  %s110_s21 = sadd.s32 1, %s813_s16 }
   0x4   : > { %p108_p0 = scmp.eq.s32.totalorder %s107_s20, 0  ;;  %p120_p1 = scmp.ne.s32.totalorder %s813_s16, %s809_s15 }
   0x5   : > { %p121_p2 = scmp.eq.s32.totalorder %s891_s18, 1  ;;  %p609_p3 = scmp.ge.s32.totalorder %s817_s17, 1 }
   0x6   : > { %s901_s22 = scalar_select %p108_p0, %s813_s16, %s110_s21  }
   0x7   : > { %p903_p4 = por %p121_p2, %p120_p1  ;;  %p171_p5 = scmp.lt.s32.totalorder %s817_s17, 3 }
   0x9   : > { %p172_p6 = pnand %p609_p3, %p171_p5 }
   0xa   : > { %s908_s24 = smul.u32 (!%p172_p6), 3, %s891_s18  ;;  %s197_s20 = sand.u32 (!%p172_p6), 1, %s809_s15  }
   0xb   : > { %175 = sbr.rel (%p172_p6) target bundleno = 582 (0x246), region = 36 }
   0xc   : > { %p205_p7 = scmp.lt.s32.totalorder (!%p172_p6), %s908_s24, 4  ;;  %s661_s21 = smul.u32 (!%p172_p6), 24, %s197_s20 }
  0x10   : > { %s206_s25 = scalar_select %p205_p7, %s908_s24, 4  ;;  %vm222_vm0 = vcmask 261120   ;;  %v286_v21 = vld [vmem:[%s988_s1 + $0x18] sm:$0xff]  ;;  %v851_v22 = vmov 0.0   ;;  %v285_v23 = vld [vmem:[%s988_s1 + $0x10] sm:$0xff]  ;;  %v284_v24 = vld [vmem:[%s988_s1 + $0x8] sm:$0xff] }
  0x11   : > { %653 = vmatprep.subr.mxu1 %v851_v22  ;;  %636 = vmatprep.subr.mxu0 %v851_v22  ;;  %v283_v25 = vld [vmem:[%s988_s1] sm:$0xff]  ;;  %vm852_vm1 = vmmov 0   ;;  %vm376_vm2 = vcmask 785408   ;;  %s388_s15 = ssub.s32 (%p903_p4), 5, %s908_s24 }
  0x12   : > { %s610_s26 = sshll.u32 %s206_s25, 3  ;;  %657 = vmatpush3.msra.mxu1 %v286_v21  ;;  %637 = vmatpush3.msra.mxu0 %v286_v21  ;;  %v611_v36 = vld [vmem:[%s989_s2] ss:$0 sm:$0xff]  ;;  %s946_s25 = scalar_lea.vmem [#allocation2], %s661_s21  }
  0x13   : > { %s208_s29 = scalar_lea.vmem %s987_s0, %s610_s26  ;;  %654 = vmatprep.subr.mxu1 %v851_v22  ;;  %638 = vmatprep.subr.mxu0 %v851_v22  ;;  %v612_v38 = vld [vmem:[%s990_s3] ss:$0 sm:$0xff]  ;;  %s628_s26 = smul.u32 (%p903_p4), 24, %s891_s18 }
  0x14   : > { %v220_v0 = vld [vmem:[%s208_s29 + $0x8] sm:$0xff]  ;;  %v221_v1 = vld [vmem:[%s208_s29 + $0x10] sm:$0xff]  ;;  %v219_v2 = vld [vmem:[%s208_s29] sm:$0xff]  ;;  %658 = vmatpush3.msra.mxu1 %v285_v23  ;;  %639 = vmatpush3.msra.mxu0 %v285_v23  ;;  %p389_p8 = scmp.lt.s32.totalorder (%p903_p4), %s388_s15, 3 }
  0x15   : > { %v226_v3 = vsel %vm222_vm0, %v220_v0, 0.0  ;;  %v229_v4 = vsel %vm222_vm0, %v221_v1, 0.0  ;;  %v223_v5 = vsel %vm222_vm0, %v219_v2, 0.0  ;;  %655 = vmatprep.subr.mxu1 %v851_v22  ;;  %647 = vmatprep.mubr.msk.f32.mxu1 %vm852_vm1, %v851_v22  ;;  %s958_s29 = scalar_lea.vmem (%p903_p4), %s991_s4, %s628_s26  }
  0x16   : > { %227 = vadd.xlane.f32.xlu0 %v226_v3  ;;  %230 = vadd.xlane.f32.xlu1 %v229_v4 }
  0x17   : > { %659 = vmatpush3.msra.mxu1 %v284_v24  ;;  %640 = vmatprep.subr.mxu0 %v851_v22 }
  0x18   : > { %656 = vmatprep.subr.mxu1 %v851_v22  ;;  %641 = vmatpush3.msra.mxu0 %v284_v24 }
  0x19   : > { %660 = vmatpush3.msra.mxu1 %v283_v25  ;;  %642 = vmatprep.subr.mxu0 %v851_v22 }
  0x1a   : > { %224 = vadd.xlane.f32.xlu0 %v223_v5  ;;  %643 = vmatpush3.msra.mxu0 %v283_v25 }
  0x1b   : > { %644 = vmatprep.mubr.msk.f32.mxu0 %vm852_vm1, %v851_v22 }
  0x9f   : > { %v228_v6 = vpop.xlane.xlu0 %227  ;;  %v231_v7 = vpop.xlane.xlu1 %230 }
  0xa0   : > { %v234_v8 = vmul.f32 0.03125, %v228_v6  ;;  %v235_v9 = vmul.f32 0.03125, %v231_v7 }
  0xa2   : > { %v237_v10 = vsub.f32 %v220_v0, %v234_v8  ;;  %v238_v11 = vsub.f32 %v221_v1, %v235_v9 }
  0xa3   : > { %v225_v12 = vpop.xlane.xlu0 %224 }
  0xa4   : > { %v233_v13 = vmul.f32 0.03125, %v225_v12  ;;  %v240_v14 = vmul.f32 %v237_v10, %v237_v10  ;;  %v241_v15 = vmul.f32 %v238_v11, %v238_v11 }
  0xa6   : > { %v236_v16 = vsub.f32 %v219_v2, %v233_v13  ;;  %v245_v17 = vsel %vm222_vm0, %v240_v14, 0.0  ;;  %v248_v18 = vsel %vm222_vm0, %v241_v15, 0.0 }
  0xa7   : > { %246 = vadd.xlane.f32.xlu1 %v245_v17 }
  0xa8   : > { %v239_v19 = vmul.f32 %v236_v16, %v236_v16 }
  0xaa   : > { %v242_v20 = vsel %vm222_vm0, %v239_v19, 0.0 }
  0xab   : > { %249 = vadd.xlane.f32.xlu1 %v248_v18  ;;  %243 = vadd.xlane.f32.xlu0 %v242_v20 }
 0x130   : > { %v247_v26 = vpop.xlane.xlu1 %246 }
 0x131   : > { %v252_v27 = vmul.f32 0.03125, %v247_v26 }
 0x133   : > { %v255_v28 = vadd.f32 1e-05, %v252_v27 }
 0x134   : > { %v250_v29 = vpop.xlane.xlu1 %249  ;;  %v244_v30 = vpop.xlane.xlu0 %243 }
 0x135   : > { %753 = vrsqrt.f32 %v255_v28  ;;  %v253_v31 = vmul.f32 0.03125, %v250_v29  ;;  %v251_v32 = vmul.f32 0.03125, %v244_v30 }
 0x137   : > { %v256_v33 = vadd.f32 1e-05, %v253_v31  ;;  %v254_v34 = vadd.f32 1e-05, %v251_v32 }
 0x139   : > { %755 = vrsqrt.f32 %v256_v33 }
 0x13a   : > { %757 = vrsqrt.f32 %v254_v34 }
 0x142   : > { %v754_v35 = vpop.eup %753 }
 0x143   : > { %v261_v37 = vmul.f32 %v754_v35, %v237_v10 }
 0x145   : > { %v271_v39 = vmul.f32 %v611_v36, %v261_v37 }
 0x146   : > { %v756_v40 = vpop.eup %755 }
 0x147   : > { %v758_v41 = vpop.eup %757  ;;  %v281_v42 = vadd.f32 %v612_v38, %v271_v39  ;;  %v262_v43 = vmul.f32 %v756_v40, %v238_v11 }
 0x148   : > { %v260_v44 = vmul.f32 %v758_v41, %v236_v16 }
 0x149   : > { %648 = vmatmul.mubr.msk.f32.vlgmr.msra.gmra.mxu1 %vm222_vm0, %v281_v42  ;;  %v272_v45 = vmul.f32 %v611_v36, %v262_v43 }
 0x14a   : > { %650 = vmatprep.mubr.msk.f32.mxu1 %vm852_vm1, %v851_v22  ;;  %v270_v46 = vmul.f32 %v611_v36, %v260_v44 }
 0x14b   : > { %v282_v47 = vadd.f32 %v612_v38, %v272_v45 }
 0x14c   : > { %v280_v48 = vadd.f32 %v612_v38, %v270_v46 }
 0x14d   : > { %651 = vmatmul.mubr.msk.f32.gmra.mxu1 %vm222_vm0, %v282_v47 }
 0x14e   : > { %645 = vmatmul.mubr.msk.f32.vlgmr.msra.gmra.mxu0 %vm222_vm0, %v280_v48 }
 0x209   : > { %v367_v49 = vpop.f32.mrf.mxu1 }
 0x20a   : > { %378 = vst.msk [vmem:[%s946_s25 + $0x8] sm:$0xff] %vm376_vm2, %v367_v49 }
 0x20b   : > { %v649_v50 = vpop.f32.mrf.mxu1 }
 0x20c   : > { %386 = sbr.rel (!%p903_p4) target bundleno = 582 (0x246), region = 40 }
 0x20d   : > { %v372_v51 = vpop.f32.mrf.mxu1 }
 0x20e   : > { %v362_v52 = vpop.f32.mrf.mxu0  ;;  %379 = vst.msk [vmem:[%s946_s25 + $0x10] sm:$0xff] %vm376_vm2, %v372_v51 }
 0x20f   : > { %377 = vst.msk [vmem:[%s946_s25] sm:$0xff] %vm376_vm2, %v362_v52  ;;  %v652_v53 = vpop.f32.mrf.mxu1 }
 0x210   : > { %v646_v54 = vpop.f32.mrf.mxu0 }
 0x211   : > { %s997_s15 = smov (!%p389_p8, %s388_s15), 3 }
 0x212   : > { %s616_s30 = sshll.u32 %s997_s15, 7 }
 0x213   : > { %p619_p9 = scmp.eq.s32.totalorder %s616_s30, 0 }
 0x214   : > { %759 = sdivrem.u32 (!%p619_p9), %s997_s15, 3 }
 0x215   : > { %397 = sbr.rel (%p619_p9) target bundleno = 582 (0x246), region = 44 }
 0x21d   : > { %s964_s23 = spop.drf %759 }
 0x21e   : > { %p620_p10 = scmp.le.s32.totalorder %s964_s23, 0 }
 0x21f   : > { %s819_s18 = smov (!%p620_p10), %s958_s29   ;;  %s823_s24 = smov (!%p620_p10), %s946_s25  }
 0x220   : > { %562 = sbr.rel (%p620_p10) target bundleno = 557 (0x22d), region = 120  ;;  %s827_s5 = smov (!%p620_p10), 0  }
 0x221   : > { %s831_s6 = smov (!%p620_p10), 0  }
 0x225 LB: >> { %v466_v55 = vld [vmem:[%s825_s24] sm:$0xff]  ;;  %v468_v56 = vld [vmem:[%s825_s24 + $0x8] sm:$0xff]  ;;  %v470_v57 = vld [vmem:[%s825_s24 + $0x10] sm:$0xff]  ;;  %s472_s7 = sadd.s32 1, %s829_s5  ;;  %s460_s6 = sadd.s32 1, %s833_s6   ;;  %s833_s6 = sphi %s831_s6, %s460_s6   ;;  %s829_s5 = sphi %s827_s5, %s828_s5   ;;  %s825_s24 = sphi %s823_s24, %s477_s24   ;;  %s821_s18 = sphi %s819_s18, %s478_s18  }
 0x226   : >> { %467 = vst [vmem:[%s821_s18] sm:$0xff] %v466_v55  ;;  %469 = vst [vmem:[%s821_s18 + $0x8] sm:$0xff] %v468_v56  ;;  %p473_p11 = scmp.ge.s32.totalorder %s472_s7, %s964_s23  ;;  %p459_p12 = scmp.ge.s32.totalorder %s460_s6, %s964_s23 }
 0x227   : >> { %471 = vst [vmem:[%s821_s18 + $0x10] sm:$0xff] %v470_v57 }
 0x228   : >> { %s999_s7 = smov (%p473_p11, %s472_s7), 0  ;;  %462 = sbr.rel (!%p459_p12) target bundleno = 549 (0x225), region = 126 }
 0x229   : >> { %s475_s8 = smul.u32 24, %s999_s7  ;;  %s828_s5 = smov %s999_s7  }
 0x22b   : >> { %s477_s24 = scalar_lea.vmem %s946_s25, %s475_s8 [#allocation2]   ;;  %s478_s18 = scalar_lea.vmem %s958_s29, %s475_s8  }
 0x22d PF: > { %761 = sdivrem.u32 %s997_s15, 3 }
 0x22e   : > { %s621_s9 = smul.u32 24, %s964_s23 }
 0x230   : > { %s483_s10 = scalar_lea.vmem %s946_s25, %s621_s9 [#allocation2]   ;;  %s485_s11 = scalar_lea.vmem %s958_s29, %s621_s9  }
 0x236   : > { %s762_s12 = spop.drf %761 }
 0x237   : > { %p623_p13 = scmp.le.s32.totalorder %s762_s12, 0 }
 0x238   : > { %s835_s13 = smov (!%p623_p13), %s485_s11   ;;  %s839_s14 = smov (!%p623_p13), %s483_s10  }
 0x239   : > { %576 = sbr.rel (%p623_p13) target bundleno = 582 (0x246), region = 131  ;;  %s843_s17 = smov (!%p623_p13), 0  }
 0x23a   : > { %s847_s20 = smov (!%p623_p13), 0  }
 0x23e LB: >> { %v495_v58 = vld [vmem:[%s841_s14] sm:$0xff]  ;;  %s497_s21 = sadd.s32 1, %s845_s17  ;;  %s489_s20 = sadd.s32 1, %s849_s20   ;;  %s849_s20 = sphi %s847_s20, %s489_s20   ;;  %s845_s17 = sphi %s843_s17, %s844_s17   ;;  %s841_s14 = sphi %s839_s14, %s502_s14   ;;  %s837_s13 = sphi %s835_s13, %s503_s13  }
 0x23f   : >> { %496 = vst [vmem:[%s837_s13] sm:$0xff] %v495_v58  ;;  %p498_p0 = scmp.ge.s32.totalorder %s497_s21, %s762_s12  ;;  %p488_p1 = scmp.ge.s32.totalorder %s489_s20, %s762_s12 }
 0x241   : >> { %s1001_s21 = smov (%p498_p0, %s497_s21), 0  ;;  %491 = sbr.rel (!%p488_p1) target bundleno = 574 (0x23e), region = 137 }
 0x242   : >> { %s624_s25 = sshll.u32 %s1001_s21, 3  ;;  %s844_s17 = smov %s1001_s21  }
 0x243   : >> { %s502_s14 = scalar_lea.vmem %s483_s10, %s624_s25 [#allocation2]   ;;  %s503_s13 = scalar_lea.vmem %s485_s11, %s624_s25  }
 0x246 PF: > { %p11_p2 = scmp.ge.s32.totalorder %s893_s19, 4   ;;  %s993_s15 = smov %s813_s16 }
 0x247   : > { %s994_s16 = smov %s901_s22  ;;  %s995_s17 = smov %s893_s19 }
 0x248   :  { %13 = sbr.rel (!%p11_p2) target bundleno = 2 (0x2), region = 148 }

// kernel: vit_forward.14
= control target key start
LH: loop header
LB: loop body
LE: loop exit
PB: predicated region body
PF: predicated region fallthrough
CT: control target
= control target key end

     0   :  { %s878_s15 = smov 0   ;;  %s880_s16 = smov 0   ;;  %s981_s0 = inlined_call_operand.vmem [shape: f32[34,32], index: 0, kind: input, shape index: {}]   ;;  %s982_s1 = inlined_call_operand.vmem [shape: f32[32,32], index: 1, kind: input, shape index: {}]   ;;  %s983_s2 = inlined_call_operand.vmem [shape: f32[1,32], index: 2, kind: input, shape index: {}]   ;;  %s984_s3 = inlined_call_operand.vmem [shape: f32[34,32], index: 3, kind: input, shape index: {}]   ;;  %s985_s4 = inlined_call_operand.vmem [shape: f32[34,32], index: 4, kind: output, shape index: {}]  }
   0x1   :  { %s882_s17 = smov 0  }
   0x2 LB: > { %s891_s18 = sadd.s32 4294967295, %s817_s17   ;;  %s893_s19 = sadd.s32 1, %s817_s17   ;;  %s817_s17 = sphi %s882_s17, %s989_s17   ;;  %s813_s16 = sphi %s880_s16, %s988_s16   ;;  %s809_s15 = sphi %s878_s15, %s987_s15  }
   0x3   : > { %s112_s20 = ssub.s32 %s817_s17, %s893_s19  ;;  %s115_s21 = sadd.s32 1, %s813_s16 }
   0x4   : > { %p113_p0 = scmp.eq.s32.totalorder %s112_s20, 0  ;;  %p125_p1 = scmp.ne.s32.totalorder %s813_s16, %s809_s15 }
   0x5   : > { %p126_p2 = scmp.eq.s32.totalorder %s891_s18, 1  ;;  %p615_p3 = scmp.ge.s32.totalorder %s817_s17, 1 }
   0x6   : > { %s901_s22 = scalar_select %p113_p0, %s813_s16, %s115_s21  }
   0x7   : > { %p903_p4 = por %p126_p2, %p125_p1  ;;  %p190_p5 = scmp.lt.s32.totalorder %s817_s17, 3 }
   0x9   : > { %p191_p6 = pnand %p615_p3, %p190_p5 }
   0xa   : > { %s911_s26 = smul.u32 (!%p191_p6), 3, %s891_s18  ;;  %s225_s12 = sand.u32 (!%p191_p6), 1, %s809_s15  }
   0xb   : > { %194 = sbr.rel (%p191_p6) target bundleno = 280 (0x118), region = 36 }
   0xc   : > { %p233_p7 = scmp.lt.s32.totalorder (!%p191_p6), %s911_s26, 4  ;;  %s667_s20 = smul.u32 (!%p191_p6), 24, %s225_s12 }
   0xe   : > { %s937_s15 = scalar_lea.vmem (!%p191_p6), [#allocation2], %s667_s20  }
  0x10   : > { %v267_v0 = vld [vmem:[%s982_s1 + $0x18] sm:$0xff]  ;;  %v851_v1 = vmov 0.0   ;;  %v266_v2 = vld [vmem:[%s982_s1 + $0x10] sm:$0xff]  ;;  %v265_v3 = vld [vmem:[%s982_s1 + $0x8] sm:$0xff]  ;;  %s234_s5 = scalar_select %p233_p7, %s911_s26, 4  ;;  %vm275_vm0 = vcmask 261120  }
  0x11   : > { %659 = vmatprep.subr.mxu1 %v851_v1  ;;  %642 = vmatprep.subr.mxu0 %v851_v1  ;;  %v264_v4 = vld [vmem:[%s982_s1] sm:$0xff]  ;;  %vm852_vm1 = vmmov 0   ;;  %s382_s25 = ssub.s32 (%p903_p4), 5, %s911_s26  ;;  %s634_s27 = smul.u32 (%p903_p4), 24, %s891_s18 }
  0x12   : > { %663 = vmatpush3.msra.mxu1 %v267_v0  ;;  %643 = vmatpush3.msra.mxu0 %v267_v0  ;;  %s616_s8 = sshll.u32 %s234_s5, 3  ;;  %v618_v8 = vld [vmem:[%s983_s2] ss:$0 sm:$0xff]  ;;  %p383_p8 = scmp.lt.s32.totalorder (%p903_p4), %s382_s25, 3 }
  0x13   : > { %660 = vmatprep.subr.mxu1 %v851_v1  ;;  %644 = vmatprep.subr.mxu0 %v851_v1  ;;  %s236_s11 = scalar_lea.vmem %s981_s0, %s616_s8  ;;  %s250_s17 = scalar_lea.vmem %s984_s3, %s616_s8 }
  0x14   : > { %664 = vmatpush3.msra.mxu1 %v266_v2  ;;  %645 = vmatpush3.msra.mxu0 %v266_v2  ;;  %v262_v5 = vld [vmem:[%s236_s11 + $0x8] sm:$0xff]  ;;  %v261_v6 = vld [vmem:[%s236_s11] sm:$0xff]  ;;  %v263_v7 = vld [vmem:[%s236_s11 + $0x10] sm:$0xff]  ;;  %s952_s30 = scalar_lea.vmem (%p903_p4), %s985_s4, %s634_s27  }
  0x15   : > { %661 = vmatprep.subr.mxu1 %v851_v1  ;;  %646 = vmatprep.subr.mxu0 %v851_v1  ;;  %v366_v10 = vld [vmem:[%s250_s17 + $0x8] sm:$0xff]  ;;  %v365_v13 = vld [vmem:[%s250_s17] sm:$0xff]  ;;  %v367_v19 = vld [vmem:[%s250_s17 + $0x10] sm:$0xff] }
  0x16   : > { %665 = vmatpush3.msra.mxu1 %v265_v3  ;;  %647 = vmatpush3.msra.mxu0 %v265_v3 }
  0x17   : > { %662 = vmatprep.subr.mxu1 %v851_v1  ;;  %653 = vmatprep.mubr.msk.f32.mxu1 %vm852_vm1, %v851_v1 }
  0x18   : > { %666 = vmatpush3.msra.mxu1 %v264_v4  ;;  %648 = vmatprep.subr.mxu0 %v851_v1 }
  0x19   : > { %654 = vmatmul.mubr.msk.f32.vlgmr.msra.gmra.mxu1 %vm275_vm0, %v262_v5  ;;  %649 = vmatpush3.msra.mxu0 %v264_v4 }
  0x1a   : > { %650 = vmatprep.mubr.msk.f32.mxu0 %vm852_vm1, %v851_v1  ;;  %656 = vmatprep.mubr.msk.f32.mxu1 %vm852_vm1, %v851_v1 }
  0x1b   : > { %651 = vmatmul.mubr.msk.f32.vlgmr.msra.gmra.mxu0 %vm275_vm0, %v261_v6 }
  0x1d   : > { %657 = vmatmul.mubr.msk.f32.gmra.mxu1 %vm275_vm0, %v263_v7 }
  0xd9   : > { %v356_v9 = vpop.f32.mrf.mxu1 }
  0xda   : > { %v357_v11 = vadd.f32 %v618_v8, %v356_v9 }
  0xdb   : > { %v351_v12 = vpop.f32.mrf.mxu0  ;;  %v655_v14 = vpop.f32.mrf.mxu1 }
  0xdc   : > { %v369_v15 = vadd.f32 %v366_v10, %v357_v11  ;;  %v352_v16 = vadd.f32 %v618_v8, %v351_v12 }
  0xdd   : > { %v652_v17 = vpop.f32.mrf.mxu0  ;;  %v361_v18 = vpop.f32.mrf.mxu1 }
  0xde   : > { %372 = vst.msk [vmem:[%s937_s15 + $0x8] sm:$0xff] %vm275_vm0, %v369_v15  ;;  %v368_v20 = vadd.f32 %v365_v13, %v352_v16  ;;  %v362_v21 = vadd.f32 %v618_v8, %v361_v18  ;;  %380 = sbr.rel (!%p903_p4) target bundleno = 280 (0x118), region = 40 }
  0xdf   : > { %v658_v22 = vpop.f32.mrf.mxu1 }
  0xe0   : > { %371 = vst.msk [vmem:[%s937_s15] sm:$0xff] %vm275_vm0, %v368_v20  ;;  %v370_v23 = vadd.f32 %v367_v19, %v362_v21 }
  0xe2   : > { %373 = vst.msk [vmem:[%s937_s15 + $0x10] sm:$0xff] %vm275_vm0, %v370_v23 }
  0xe3   : > { %s991_s25 = smov (!%p383_p8, %s382_s25), 3 }
  0xe4   : > { %s622_s5 = sshll.u32 %s991_s25, 7 }
  0xe5   : > { %p625_p9 = scmp.eq.s32.totalorder %s622_s5, 0 }
  0xe6   : > { %759 = sdivrem.u32 (!%p625_p9), %s991_s25, 3 }
  0xe7   : > { %391 = sbr.rel (%p625_p9) target bundleno = 280 (0x118), region = 44 }
  0xef   : > { %s958_s23 = spop.drf %759 }
  0xf0   : > { %p626_p10 = scmp.le.s32.totalorder %s958_s23, 0 }
  0xf1   : > { %s819_s18 = smov (!%p626_p10), %s952_s30   ;;  %s823_s26 = smov (!%p626_p10), %s937_s15  }
  0xf2   : > { %562 = sbr.rel (%p626_p10) target bundleno = 255 (0xff), region = 123  ;;  %s827_s6 = smov (!%p626_p10), 0  }
  0xf3   : > { %s831_s7 = smov (!%p626_p10), 0  }
  0xf7 LB: >> { %v460_v24 = vld [vmem:[%s825_s26] sm:$0xff]  ;;  %v462_v25 = vld [vmem:[%s825_s26 + $0x8] sm:$0xff]  ;;  %v464_v26 = vld [vmem:[%s825_s26 + $0x10] sm:$0xff]  ;;  %s466_s8 = sadd.s32 1, %s829_s6  ;;  %s454_s7 = sadd.s32 1, %s833_s7   ;;  %s833_s7 = sphi %s831_s7, %s454_s7   ;;  %s829_s6 = sphi %s827_s6, %s828_s6   ;;  %s825_s26 = sphi %s823_s26, %s471_s26   ;;  %s821_s18 = sphi %s819_s18, %s472_s18  }
  0xf8   : >> { %461 = vst [vmem:[%s821_s18] sm:$0xff] %v460_v24  ;;  %463 = vst [vmem:[%s821_s18 + $0x8] sm:$0xff] %v462_v25  ;;  %p467_p11 = scmp.ge.s32.totalorder %s466_s8, %s958_s23  ;;  %p453_p12 = scmp.ge.s32.totalorder %s454_s7, %s958_s23 }
  0xf9   : >> { %465 = vst [vmem:[%s821_s18 + $0x10] sm:$0xff] %v464_v26 }
  0xfa   : >> { %s993_s8 = smov (%p467_p11, %s466_s8), 0  ;;  %456 = sbr.rel (!%p453_p12) target bundleno = 247 (0xf7), region = 129 }
  0xfb   : >> { %s469_s9 = smul.u32 24, %s993_s8  ;;  %s828_s6 = smov %s993_s8  }
  0xfd   : >> { %s471_s26 = scalar_lea.vmem %s937_s15, %s469_s9 [#allocation2]   ;;  %s472_s18 = scalar_lea.vmem %s952_s30, %s469_s9  }
  0xff PF: > { %761 = sdivrem.u32 %s991_s25, 3 }
 0x100   : > { %s627_s10 = smul.u32 24, %s958_s23 }
 0x102   : > { %s477_s11 = scalar_lea.vmem %s937_s15, %s627_s10 [#allocation2]   ;;  %s479_s12 = scalar_lea.vmem %s952_s30, %s627_s10  }
 0x108   : > { %s762_s13 = spop.drf %761 }
 0x109   : > { %p629_p13 = scmp.le.s32.totalorder %s762_s13, 0 }
 0x10a   : > { %s835_s14 = smov (!%p629_p13), %s479_s12   ;;  %s839_s17 = smov (!%p629_p13), %s477_s11  }
 0x10b   : > { %576 = sbr.rel (%p629_p13) target bundleno = 280 (0x118), region = 134  ;;  %s843_s20 = smov (!%p629_p13), 0  }
 0x10c   : > { %s847_s21 = smov (!%p629_p13), 0  }
 0x110 LB: >> { %v489_v27 = vld [vmem:[%s841_s17] sm:$0xff]  ;;  %s491_s24 = sadd.s32 1, %s845_s20  ;;  %s483_s21 = sadd.s32 1, %s849_s21   ;;  %s849_s21 = sphi %s847_s21, %s483_s21   ;;  %s845_s20 = sphi %s843_s20, %s844_s20   ;;  %s841_s17 = sphi %s839_s17, %s496_s17   ;;  %s837_s14 = sphi %s835_s14, %s497_s14  }
 0x111   : >> { %490 = vst [vmem:[%s837_s14] sm:$0xff] %v489_v27  ;;  %p492_p0 = scmp.ge.s32.totalorder %s491_s24, %s762_s13  ;;  %p482_p1 = scmp.ge.s32.totalorder %s483_s21, %s762_s13 }
 0x113   : >> { %s995_s24 = smov (%p492_p0, %s491_s24), 0  ;;  %485 = sbr.rel (!%p482_p1) target bundleno = 272 (0x110), region = 140 }
 0x114   : >> { %s630_s15 = sshll.u32 %s995_s24, 3  ;;  %s844_s20 = smov %s995_s24  }
 0x115   : >> { %s496_s17 = scalar_lea.vmem %s477_s11, %s630_s15 [#allocation2]   ;;  %s497_s14 = scalar_lea.vmem %s479_s12, %s630_s15  }
 0x118 PF: > { %p11_p2 = scmp.ge.s32.totalorder %s893_s19, 4   ;;  %s987_s15 = smov %s813_s16 }
 0x119   : > { %s988_s16 = smov %s901_s22  ;;  %s989_s17 = smov %s893_s19 }
 0x11a   :  { %13 = sbr.rel (!%p11_p2) target bundleno = 2 (0x2), region = 151 }

// kernel: vit_forward.16
= control target key start
LH: loop header
LB: loop body
LE: loop exit
PB: predicated region body
PF: predicated region fallthrough
CT: control target
= control target key end

     0   :  { %s903_s15 = smov 0   ;;  %s905_s16 = smov 0   ;;  %s1022_s0 = inlined_call_operand.vmem [shape: f32[34,64], index: 0, kind: input, shape index: {}]   ;;  %s1023_s1 = inlined_call_operand.vmem [shape: f32[64,32], index: 1, kind: input, shape index: {}]   ;;  %s1024_s2 = inlined_call_operand.vmem [shape: f32[1,32], index: 2, kind: input, shape index: {}]   ;;  %s1025_s3 = inlined_call_operand.vmem [shape: f32[34,32], index: 3, kind: input, shape index: {}]   ;;  %s1026_s4 = inlined_call_operand.vmem [shape: f32[34,32], index: 4, kind: output, shape index: {}]  }
   0x1   :  { %s907_s17 = smov 0  }
   0x2 LB: > { %s916_s18 = sadd.s32 4294967295, %s842_s17   ;;  %s918_s19 = sadd.s32 1, %s842_s17   ;;  %s842_s17 = sphi %s907_s17, %s1030_s17   ;;  %s838_s16 = sphi %s905_s16, %s1029_s16   ;;  %s834_s15 = sphi %s903_s15, %s1028_s15  }
   0x3   : > { %s112_s20 = ssub.s32 %s842_s17, %s918_s19  ;;  %s115_s21 = sadd.s32 1, %s838_s16 }
   0x4   : > { %p113_p0 = scmp.eq.s32.totalorder %s112_s20, 0  ;;  %p125_p1 = scmp.ne.s32.totalorder %s838_s16, %s834_s15 }
   0x5   : > { %p126_p2 = scmp.eq.s32.totalorder %s916_s18, 1  ;;  %p620_p3 = scmp.ge.s32.totalorder %s842_s17, 1 }
   0x6   : > { %s926_s22 = scalar_select %p113_p0, %s838_s16, %s115_s21  }
   0x7   : > { %p928_p4 = por %p126_p2, %p125_p1  ;;  %p190_p5 = scmp.lt.s32.totalorder %s842_s17, 3 }
   0x9   : > { %p191_p6 = pnand %p620_p3, %p190_p5 }
   0xa   : > { %s936_s26 = smul.u32 (!%p191_p6), 3, %s916_s18  ;;  %s225_s27 = sand.u32 (!%p191_p6), 1, %s834_s15  }
   0xb   : > { %194 = sbr.rel (%p191_p6) target bundleno = 288 (0x120), region = 36 }
   0xc   : > { %p233_p7 = scmp.lt.s32.totalorder (!%p191_p6), %s936_s26, 4  ;;  %s692_s6 = smul.u32 (!%p191_p6), 24, %s225_s27 }
   0xe   : > { %s978_s15 = scalar_lea.vmem (!%p191_p6), [#allocation2], %s692_s6  }
  0x10   : > { %v271_v0 = vld [vmem:[%s1023_s1 + $0x38] sm:$0xff]  ;;  %v876_v1 = vmov 0.0   ;;  %v270_v2 = vld [vmem:[%s1023_s1 + $0x30] sm:$0xff]  ;;  %v269_v3 = vld [vmem:[%s1023_s1 + $0x28] sm:$0xff]  ;;  %s946_s5 = scalar_select %p233_p7, %s936_s26, 4  ;;  %vm279_vm0 = vcmask 523264  }
  0x11   : > { %676 = vmatprep.subr.mxu1 %v876_v1  ;;  %651 = vmatprep.subr.mxu0 %v876_v1  ;;  %v268_v4 = vld [vmem:[%s1023_s1 + $0x20] sm:$0xff]  ;;  %v267_v5 = vld [vmem:[%s1023_s1 + $0x18] sm:$0xff]  ;;  %v266_v6 = vld [vmem:[%s1023_s1 + $0x10] sm:$0xff]  ;;  %vm877_vm1 = vmmov 0   ;;  %vm375_vm2 = vcmask 261120   ;;  %s639_s9 = smul.u32 (%p928_p4), 24, %s916_s18 }
  0x12   : > { %684 = vmatpush3.msra.mxu1 %v271_v0  ;;  %652 = vmatpush3.msra.mxu0 %v271_v0  ;;  %s621_s10 = sshll.u32 %s946_s5, 3  ;;  %v265_v7 = vld [vmem:[%s1023_s1 + $0x8] sm:$0xff]  ;;  %v264_v8 = vld [vmem:[%s1023_s1] sm:$0xff]  ;;  %s387_s5 = ssub.s32 (%p928_p4), 5, %s936_s26 }
  0x13   : > { %677 = vmatprep.subr.mxu1 %v876_v1  ;;  %653 = vmatprep.subr.mxu0 %v876_v1  ;;  %s236_s21 = scalar_lea.vmem %s1022_s0, %s621_s10  ;;  %s250_s30 = scalar_lea.vmem %s1025_s3, %s621_s10  ;;  %v623_v12 = vld [vmem:[%s1024_s2] ss:$0 sm:$0xff] }
  0x14   : > { %685 = vmatpush3.msra.mxu1 %v270_v2  ;;  %654 = vmatpush3.msra.mxu0 %v270_v2  ;;  %v262_v9 = vld [vmem:[%s236_s21 + $0x8] sm:$0xff]  ;;  %v261_v10 = vld [vmem:[%s236_s21] sm:$0xff]  ;;  %v263_v11 = vld [vmem:[%s236_s21 + $0x10] sm:$0xff]  ;;  %p388_p8 = scmp.lt.s32.totalorder (%p928_p4), %s387_s5, 3  ;;  %s993_s12 = scalar_lea.vmem (%p928_p4), %s1026_s4, %s639_s9  }
  0x15   : > { %678 = vmatprep.subr.mxu1 %v876_v1  ;;  %655 = vmatprep.subr.mxu0 %v876_v1  ;;  %v370_v14 = vld [vmem:[%s250_s30 + $0x8] sm:$0xff]  ;;  %v369_v17 = vld [vmem:[%s250_s30] sm:$0xff]  ;;  %v371_v23 = vld [vmem:[%s250_s30 + $0x10] sm:$0xff] }
  0x16   : > { %686 = vmatpush3.msra.mxu1 %v269_v3  ;;  %656 = vmatpush3.msra.mxu0 %v269_v3 }
  0x17   : > { %679 = vmatprep.subr.mxu1 %v876_v1  ;;  %657 = vmatprep.subr.mxu0 %v876_v1 }
  0x18   : > { %687 = vmatpush3.msra.mxu1 %v268_v4  ;;  %658 = vmatpush3.msra.mxu0 %v268_v4 }
  0x19   : > { %680 = vmatprep.subr.mxu1 %v876_v1  ;;  %659 = vmatprep.subr.mxu0 %v876_v1 }
  0x1a   : > { %688 = vmatpush3.msra.mxu1 %v267_v5  ;;  %660 = vmatpush3.msra.mxu0 %v267_v5 }
  0x1b   : > { %681 = vmatprep.subr.mxu1 %v876_v1  ;;  %661 = vmatprep.subr.mxu0 %v876_v1 }
  0x1c   : > { %689 = vmatpush3.msra.mxu1 %v266_v6  ;;  %662 = vmatpush3.msra.mxu0 %v266_v6 }
  0x1d   : > { %682 = vmatprep.subr.mxu1 %v876_v1  ;;  %663 = vmatprep.subr.mxu0 %v876_v1 }
  0x1e   : > { %690 = vmatpush3.msra.mxu1 %v265_v7  ;;  %664 = vmatpush3.msra.mxu0 %v265_v7 }
  0x1f   : > { %683 = vmatprep.subr.mxu1 %v876_v1  ;;  %670 = vmatprep.mubr.msk.f32.mxu1 %vm877_vm1, %v876_v1 }
  0x20   : > { %691 = vmatpush3.msra.mxu1 %v264_v8  ;;  %665 = vmatprep.subr.mxu0 %v876_v1 }
  0x21   : > { %671 = vmatmul.mubr.msk.f32.vlgmr.msra.gmra.mxu1 %vm279_vm0, %v262_v9  ;;  %666 = vmatpush3.msra.mxu0 %v264_v8 }
  0x22   : > { %667 = vmatprep.mubr.msk.f32.mxu0 %vm877_vm1, %v876_v1  ;;  %673 = vmatprep.mubr.msk.f32.mxu1 %vm877_vm1, %v876_v1 }
  0x23   : > { %668 = vmatmul.mubr.msk.f32.vlgmr.msra.gmra.mxu0 %vm279_vm0, %v261_v10 }
  0x25   : > { %674 = vmatmul.mubr.msk.f32.gmra.mxu1 %vm279_vm0, %v263_v11 }
  0xe1   : > { %v360_v13 = vpop.f32.mrf.mxu1 }
  0xe2   : > { %v361_v15 = vadd.f32 %v623_v12, %v360_v13 }
  0xe3   : > { %v355_v16 = vpop.f32.mrf.mxu0  ;;  %v672_v18 = vpop.f32.mrf.mxu1 }
  0xe4   : > { %v373_v19 = vadd.f32 %v370_v14, %v361_v15  ;;  %v356_v20 = vadd.f32 %v623_v12, %v355_v16 }
  0xe5   : > { %v669_v21 = vpop.f32.mrf.mxu0  ;;  %v365_v22 = vpop.f32.mrf.mxu1 }
  0xe6   : > { %377 = vst.msk [vmem:[%s978_s15 + $0x8] sm:$0xff] %vm375_vm2, %v373_v19  ;;  %v372_v24 = vadd.f32 %v369_v17, %v356_v20  ;;  %v366_v25 = vadd.f32 %v623_v12, %v365_v22  ;;  %385 = sbr.rel (!%p928_p4) target bundleno = 288 (0x120), region = 40 }
  0xe7   : > { %v675_v26 = vpop.f32.mrf.mxu1 }
  0xe8   : > { %376 = vst.msk [vmem:[%s978_s15] sm:$0xff] %vm375_vm2, %v372_v24  ;;  %v374_v27 = vadd.f32 %v371_v23, %v366_v25 }
  0xea   : > { %378 = vst.msk [vmem:[%s978_s15 + $0x10] sm:$0xff] %vm375_vm2, %v374_v27 }
  0xeb   : > { %s1032_s5 = smov (!%p388_p8, %s387_s5), 3 }
  0xec   : > { %s627_s13 = sshll.u32 %s1032_s5, 7 }
  0xed   : > { %p630_p9 = scmp.eq.s32.totalorder %s627_s13, 0 }
  0xee   : > { %784 = sdivrem.u32 (!%p630_p9), %s1032_s5, 3 }
  0xef   : > { %396 = sbr.rel (%p630_p9) target bundleno = 288 (0x120), region = 44 }
  0xf7   : > { %s999_s23 = spop.drf %784 }
  0xf8   : > { %p631_p10 = scmp.le.s32.totalorder %s999_s23, 0 }
  0xf9   : > { %s844_s18 = smov (!%p631_p10), %s993_s12   ;;  %s848_s26 = smov (!%p631_p10), %s978_s15  }
  0xfa   : > { %567 = sbr.rel (%p631_p10) target bundleno = 263 (0x107), region = 123  ;;  %s852_s14 = smov (!%p631_p10), 0  }
  0xfb   : > { %s856_s17 = smov (!%p631_p10), 0  }
  0xff LB: >> { %v465_v28 = vld [vmem:[%s850_s26] sm:$0xff]  ;;  %v467_v29 = vld [vmem:[%s850_s26 + $0x8] sm:$0xff]  ;;  %v469_v30 = vld [vmem:[%s850_s26 + $0x10] sm:$0xff]  ;;  %s471_s20 = sadd.s32 1, %s854_s14  ;;  %s459_s17 = sadd.s32 1, %s858_s17   ;;  %s858_s17 = sphi %s856_s17, %s459_s17   ;;  %s854_s14 = sphi %s852_s14, %s853_s14   ;;  %s850_s26 = sphi %s848_s26, %s476_s26   ;;  %s846_s18 = sphi %s844_s18, %s477_s18  }
 0x100   : >> { %466 = vst [vmem:[%s846_s18] sm:$0xff] %v465_v28  ;;  %468 = vst [vmem:[%s846_s18 + $0x8] sm:$0xff] %v467_v29  ;;  %p472_p11 = scmp.ge.s32.totalorder %s471_s20, %s999_s23  ;;  %p458_p12 = scmp.ge.s32.totalorder %s459_s17, %s999_s23 }
 0x101   : >> { %470 = vst [vmem:[%s846_s18 + $0x10] sm:$0xff] %v469_v30 }
 0x102   : >> { %s1034_s20 = smov (%p472_p11, %s471_s20), 0  ;;  %461 = sbr.rel (!%p458_p12) target bundleno = 255 (0xff), region = 129 }
 0x103   : >> { %s474_s21 = smul.u32 24, %s1034_s20  ;;  %s853_s14 = smov %s1034_s20  }
 0x105   : >> { %s476_s26 = scalar_lea.vmem %s978_s15, %s474_s21 [#allocation2]   ;;  %s477_s18 = scalar_lea.vmem %s993_s12, %s474_s21  }
 0x107 PF: > { %786 = sdivrem.u32 %s1032_s5, 3 }
 0x108   : > { %s632_s24 = smul.u32 24, %s999_s23 }
 0x10a   : > { %s482_s25 = scalar_lea.vmem %s978_s15, %s632_s24 [#allocation2]   ;;  %s484_s27 = scalar_lea.vmem %s993_s12, %s632_s24  }
 0x110   : > { %s787_s28 = spop.drf %786 }
 0x111   : > { %p634_p13 = scmp.le.s32.totalorder %s787_s28, 0 }
 0x112   : > { %s860_s29 = smov (!%p634_p13), %s484_s27   ;;  %s864_s30 = smov (!%p634_p13), %s482_s25  }
 0x113   : > { %581 = sbr.rel (%p634_p13) target bundleno = 288 (0x120), region = 134  ;;  %s868_s6 = smov (!%p634_p13), 0  }
 0x114   : > { %s872_s7 = smov (!%p634_p13), 0  }
 0x118 LB: >> { %v494_v31 = vld [vmem:[%s866_s30] sm:$0xff]  ;;  %s496_s8 = sadd.s32 1, %s870_s6  ;;  %s488_s7 = sadd.s32 1, %s874_s7   ;;  %s874_s7 = sphi %s872_s7, %s488_s7   ;;  %s870_s6 = sphi %s868_s6, %s869_s6   ;;  %s866_s30 = sphi %s864_s30, %s501_s30   ;;  %s862_s29 = sphi %s860_s29, %s502_s29  }
 0x119   : >> { %495 = vst [vmem:[%s862_s29] sm:$0xff] %v494_v31  ;;  %p497_p0 = scmp.ge.s32.totalorder %s496_s8, %s787_s28  ;;  %p487_p1 = scmp.ge.s32.totalorder %s488_s7, %s787_s28 }
 0x11b   : >> { %s1036_s8 = smov (%p497_p0, %s496_s8), 0  ;;  %490 = sbr.rel (!%p487_p1) target bundleno = 280 (0x118), region = 140 }
 0x11c   : >> { %s635_s15 = sshll.u32 %s1036_s8, 3  ;;  %s869_s6 = smov %s1036_s8  }
 0x11d   : >> { %s501_s30 = scalar_lea.vmem %s482_s25, %s635_s15 [#allocation2]   ;;  %s502_s29 = scalar_lea.vmem %s484_s27, %s635_s15  }
 0x120 PF: > { %p11_p2 = scmp.ge.s32.totalorder %s918_s19, 4   ;;  %s1028_s15 = smov %s838_s16 }
 0x121   : > { %s1029_s16 = smov %s926_s22  ;;  %s1030_s17 = smov %s918_s19 }
 0x122   :  { %13 = sbr.rel (!%p11_p2) target bundleno = 2 (0x2), region = 151 }

// kernel: vit_forward.15
= control target key start
LH: loop header
LB: loop body
LE: loop exit
PB: predicated region body
PF: predicated region fallthrough
CT: control target
= control target key end

     0   :  { %s951_s18 = smov 0   ;;  %s953_s19 = smov 0   ;;  %s1063_s0 = inlined_call_operand.vmem [shape: f32[34,32], index: 0, kind: input, shape index: {}]   ;;  %s1064_s1 = inlined_call_operand.vmem [shape: f32[32,64], index: 1, kind: input, shape index: {}]   ;;  %s1065_s2 = inlined_call_operand.vmem [shape: f32[1,32], index: 2, kind: input, shape index: {}]   ;;  %s1066_s3 = inlined_call_operand.vmem [shape: f32[1,32], index: 3, kind: input, shape index: {}]   ;;  %s1067_s4 = inlined_call_operand.vmem [shape: f32[1,64], index: 4, kind: input, shape index: {}]   ;;  %s1068_s5 = inlined_call_operand.vmem [shape: f32[34,64], index: 5, kind: output, shape index: {}]  }
   0x1   :  { %s955_s20 = smov 0  }
   0x2 LB: > { %s964_s21 = sadd.s32 4294967295, %s885_s20   ;;  %s966_s22 = sadd.s32 1, %s885_s20   ;;  %s885_s20 = sphi %s955_s20, %s1072_s20   ;;  %s881_s19 = sphi %s953_s19, %s1071_s19   ;;  %s877_s18 = sphi %s951_s18, %s1070_s18  }
   0x3   : > { %s129_s23 = ssub.s32 %s885_s20, %s966_s22  ;;  %s132_s24 = sadd.s32 1, %s881_s19 }
   0x4   : > { %p130_p0 = scmp.eq.s32.totalorder %s129_s23, 0  ;;  %p142_p1 = scmp.ne.s32.totalorder %s881_s19, %s877_s18 }
   0x5   : > { %p143_p2 = scmp.eq.s32.totalorder %s964_s21, 1  ;;  %p670_p3 = scmp.ge.s32.totalorder %s885_s20, 1 }
   0x6   : > { %s974_s25 = scalar_select %p130_p0, %s881_s19, %s132_s24  }
   0x7   : > { %p976_p4 = por %p143_p2, %p142_p1  ;;  %p196_p5 = scmp.lt.s32.totalorder %s885_s20, 3 }
   0x9   : > { %p197_p6 = pnand %p670_p3, %p196_p5 }
   0xa   : > { %s981_s27 = smul.u32 (!%p197_p6), 3, %s964_s21 }
   0xb   : > { %200 = sbr.rel (%p197_p6) target bundleno = 613 (0x265), region = 40 }
   0xc   : > { %p232_p7 = scmp.lt.s32.totalorder (!%p197_p6), %s981_s27, 4 }
  0x10   : > { %s233_s28 = scalar_select %p232_p7, %s981_s27, 4  ;;  %vm249_vm0 = vcmask 261120   ;;  %v313_v21 = vld [vmem:[%s1064_s1 + $0x18] sm:$0xff]  ;;  %v919_v22 = vmov 0.0   ;;  %v312_v23 = vld [vmem:[%s1064_s1 + $0x10] sm:$0xff]  ;;  %v311_v24 = vld [vmem:[%s1064_s1 + $0x8] sm:$0xff] }
  0x11   : > { %715 = vmatprep.subr.mxu1 %v919_v22  ;;  %698 = vmatprep.subr.mxu0 %v919_v22  ;;  %v310_v25 = vld [vmem:[%s1064_s1] sm:$0xff]  ;;  %vm920_vm1 = vmmov 0   ;;  %vm437_vm2 = vcmask 523264  }
  0x12   : > { %s671_s29 = sshll.u32 %s233_s28, 3  ;;  %719 = vmatpush3.msra.mxu1 %v313_v21  ;;  %699 = vmatpush3.msra.mxu0 %v313_v21  ;;  %v672_v36 = vld [vmem:[%s1065_s2] ss:$0 sm:$0xff] }
  0x13   : > { %s235_s7 = scalar_lea.vmem %s1063_s0, %s671_s29  ;;  %716 = vmatprep.subr.mxu1 %v919_v22  ;;  %700 = vmatprep.subr.mxu0 %v919_v22  ;;  %v673_v38 = vld [vmem:[%s1066_s3] ss:$0 sm:$0xff]  ;;  %s224_s29 = sand.u32 1, %s877_s18  }
  0x14   : > { %v247_v0 = vld [vmem:[%s235_s7 + $0x8] sm:$0xff]  ;;  %v248_v1 = vld [vmem:[%s235_s7 + $0x10] sm:$0xff]  ;;  %v246_v2 = vld [vmem:[%s235_s7] sm:$0xff]  ;;  %720 = vmatpush3.msra.mxu1 %v312_v23  ;;  %701 = vmatpush3.msra.mxu0 %v312_v23  ;;  %s723_s30 = smul.u32 24, %s224_s29  ;;  %s449_s18 = ssub.s32 (%p976_p4), 5, %s981_s27 }
  0x15   : > { %v253_v3 = vsel %vm249_vm0, %v247_v0, 0.0  ;;  %v256_v4 = vsel %vm249_vm0, %v248_v1, 0.0  ;;  %v250_v5 = vsel %vm249_vm0, %v246_v2, 0.0  ;;  %717 = vmatprep.subr.mxu1 %v919_v22  ;;  %709 = vmatprep.mubr.msk.f32.mxu1 %vm920_vm1, %v919_v22  ;;  %v674_v49 = vld [vmem:[%s1067_s4] ss:$0 sm:$0xff]  ;;  %s690_s7 = smul.u32 (%p976_p4), 24, %s964_s21 }
  0x16   : > { %254 = vadd.xlane.f32.xlu0 %v253_v3  ;;  %257 = vadd.xlane.f32.xlu1 %v256_v4  ;;  %s1022_s6 = scalar_lea.vmem [#allocation2], %s723_s30   ;;  %p450_p8 = scmp.lt.s32.totalorder (%p976_p4), %s449_s18, 3 }
  0x17   : > { %721 = vmatpush3.msra.mxu1 %v311_v24  ;;  %702 = vmatprep.subr.mxu0 %v919_v22  ;;  %s1034_s10 = scalar_lea.vmem (%p976_p4), %s1068_s5, %s690_s7  }
  0x18   : > { %718 = vmatprep.subr.mxu1 %v919_v22  ;;  %703 = vmatpush3.msra.mxu0 %v311_v24 }
  0x19   : > { %722 = vmatpush3.msra.mxu1 %v310_v25  ;;  %704 = vmatprep.subr.mxu0 %v919_v22 }
  0x1a   : > { %251 = vadd.xlane.f32.xlu0 %v250_v5  ;;  %705 = vmatpush3.msra.mxu0 %v310_v25 }
  0x1b   : > { %706 = vmatprep.mubr.msk.f32.mxu0 %vm920_vm1, %v919_v22 }
  0x9f   : > { %v255_v6 = vpop.xlane.xlu0 %254  ;;  %v258_v7 = vpop.xlane.xlu1 %257 }
  0xa0   : > { %v261_v8 = vmul.f32 0.03125, %v255_v6  ;;  %v262_v9 = vmul.f32 0.03125, %v258_v7 }
  0xa2   : > { %v264_v10 = vsub.f32 %v247_v0, %v261_v8  ;;  %v265_v11 = vsub.f32 %v248_v1, %v262_v9 }
  0xa3   : > { %v252_v12 = vpop.xlane.xlu0 %251 }
  0xa4   : > { %v260_v13 = vmul.f32 0.03125, %v252_v12  ;;  %v267_v14 = vmul.f32 %v264_v10, %v264_v10  ;;  %v268_v15 = vmul.f32 %v265_v11, %v265_v11 }
  0xa6   : > { %v263_v16 = vsub.f32 %v246_v2, %v260_v13  ;;  %v272_v17 = vsel %vm249_vm0, %v267_v14, 0.0  ;;  %v275_v18 = vsel %vm249_vm0, %v268_v15, 0.0 }
  0xa7   : > { %273 = vadd.xlane.f32.xlu1 %v272_v17 }
  0xa8   : > { %v266_v19 = vmul.f32 %v263_v16, %v263_v16 }
  0xaa   : > { %v269_v20 = vsel %vm249_vm0, %v266_v19, 0.0 }
  0xab   : > { %276 = vadd.xlane.f32.xlu1 %v275_v18  ;;  %270 = vadd.xlane.f32.xlu0 %v269_v20 }
 0x130   : > { %v274_v26 = vpop.xlane.xlu1 %273 }
 0x131   : > { %v279_v27 = vmul.f32 0.03125, %v274_v26 }
 0x133   : > { %v282_v28 = vadd.f32 1e-05, %v279_v27 }
 0x134   : > { %v277_v29 = vpop.xlane.xlu1 %276  ;;  %v271_v30 = vpop.xlane.xlu0 %270 }
 0x135   : > { %815 = vrsqrt.f32 %v282_v28  ;;  %v280_v31 = vmul.f32 0.03125, %v277_v29  ;;  %v278_v32 = vmul.f32 0.03125, %v271_v30 }
 0x137   : > { %v283_v33 = vadd.f32 1e-05, %v280_v31  ;;  %v281_v34 = vadd.f32 1e-05, %v278_v32 }
 0x139   : > { %817 = vrsqrt.f32 %v283_v33 }
 0x13a   : > { %819 = vrsqrt.f32 %v281_v34 }
 0x142   : > { %v816_v35 = vpop.eup %815 }
 0x143   : > { %v288_v37 = vmul.f32 %v816_v35, %v264_v10 }
 0x145   : > { %v298_v39 = vmul.f32 %v672_v36, %v288_v37 }
 0x146   : > { %v818_v40 = vpop.eup %817 }
 0x147   : > { %v820_v41 = vpop.eup %819  ;;  %v308_v42 = vadd.f32 %v673_v38, %v298_v39  ;;  %v289_v43 = vmul.f32 %v818_v40, %v265_v11 }
 0x148   : > { %v287_v44 = vmul.f32 %v820_v41, %v263_v16 }
 0x149   : > { %710 = vmatmul.mubr.msk.f32.vlgmr.msra.gmra.mxu1 %vm249_vm0, %v308_v42  ;;  %v299_v45 = vmul.f32 %v672_v36, %v289_v43 }
 0x14a   : > { %712 = vmatprep.mubr.msk.f32.mxu1 %vm920_vm1, %v919_v22  ;;  %v297_v46 = vmul.f32 %v672_v36, %v287_v44 }
 0x14b   : > { %v309_v47 = vadd.f32 %v673_v38, %v299_v45 }
 0x14c   : > { %v307_v48 = vadd.f32 %v673_v38, %v297_v46 }
 0x14d   : > { %713 = vmatmul.mubr.msk.f32.gmra.mxu1 %vm249_vm0, %v309_v47 }
 0x14e   : > { %707 = vmatmul.mubr.msk.f32.vlgmr.msra.gmra.mxu0 %vm249_vm0, %v307_v48 }
 0x209   : > { %v401_v50 = vpop.f32.mrf.mxu1 }
 0x20a   : > { %v402_v51 = vadd.f32 %v674_v49, %v401_v50 }
 0x20b   : > { %v711_v52 = vpop.f32.mrf.mxu1 }
 0x20c   : > { %v411_v53 = vmul.f32 %v402_v51, %v402_v51 }
 0x20d   : > { %v406_v54 = vpop.f32.mrf.mxu1 }
 0x20e   : > { %v414_v55 = vmul.f32 %v411_v53, %v402_v51  ;;  %v396_v56 = vpop.f32.mrf.mxu0  ;;  %v407_v57 = vadd.f32 %v674_v49, %v406_v54 }
 0x20f   : > { %v397_v58 = vadd.f32 %v674_v49, %v396_v56  ;;  %v714_v59 = vpop.f32.mrf.mxu1 }
 0x210   : > { %v417_v60 = vmul.f32 0.044715, %v414_v55  ;;  %v412_v61 = vmul.f32 %v407_v57, %v407_v57  ;;  %v708_v62 = vpop.f32.mrf.mxu0 }
 0x211   : > { %v410_v63 = vmul.f32 %v397_v58, %v397_v58 }
 0x212   : > { %v420_v0 = vadd.f32 %v417_v60, %v402_v51  ;;  %v415_v1 = vmul.f32 %v412_v61, %v407_v57 }
 0x213   : > { %v413_v2 = vmul.f32 %v410_v63, %v397_v58 }
 0x214   : > { %v423_v3 = vmul.f32 0.7978846, %v420_v0  ;;  %v418_v4 = vmul.f32 0.044715, %v415_v1 }
 0x215   : > { %v416_v5 = vmul.f32 0.044715, %v413_v2 }
 0x216   : > { %821 = vtanh.f32 %v423_v3  ;;  %v421_v6 = vadd.f32 %v418_v4, %v407_v57 }
 0x217   : > { %v419_v7 = vadd.f32 %v416_v5, %v397_v58 }
 0x218   : > { %v424_v8 = vmul.f32 0.7978846, %v421_v6 }
 0x219   : > { %v422_v9 = vmul.f32 0.7978846, %v419_v7 }
 0x21a   : > { %823 = vtanh.f32 %v424_v8 }
 0x21b   : > { %825 = vtanh.f32 %v422_v9 }
 0x223   : > { %v822_v10 = vpop.eup %821 }
 0x224   : > { %v429_v11 = vadd.f32 1.0, %v822_v10 }
 0x226   : > { %v432_v12 = vmul.f32 0.5, %v429_v11 }
 0x227   : > { %v824_v13 = vpop.eup %823 }
 0x228   : > { %v826_v14 = vpop.eup %825  ;;  %v435_v15 = vmul.f32 %v432_v12, %v402_v51  ;;  %v430_v16 = vadd.f32 1.0, %v824_v13 }
 0x229   : > { %v428_v17 = vadd.f32 1.0, %v826_v14 }
 0x22a   : > { %439 = vst.msk [vmem:[%s1022_s6 + $0x8] sm:$0xff] %vm437_vm2, %v435_v15  ;;  %v433_v18 = vmul.f32 0.5, %v430_v16 }
 0x22b   : > { %v431_v19 = vmul.f32 0.5, %v428_v17  ;;  %447 = sbr.rel (!%p976_p4) target bundleno = 613 (0x265), region = 44 }
 0x22c   : > { %v436_v20 = vmul.f32 %v433_v18, %v407_v57 }
 0x22d   : > { %v434_v21 = vmul.f32 %v431_v19, %v397_v58 }
 0x22e   : > { %440 = vst.msk [vmem:[%s1022_s6 + $0x10] sm:$0xff] %vm437_vm2, %v436_v20 }
 0x22f   : > { %438 = vst.msk [vmem:[%s1022_s6] sm:$0xff] %vm437_vm2, %v434_v21 }
 0x230   : > { %s1074_s18 = smov (!%p450_p8, %s449_s18), 3 }
 0x231   : > { %s678_s11 = sshll.u32 %s1074_s18, 7 }
 0x232   : > { %p681_p9 = scmp.eq.s32.totalorder %s678_s11, 0 }
 0x233   : > { %827 = sdivrem.u32 (!%p681_p9), %s1074_s18, 3 }
 0x234   : > { %458 = sbr.rel (%p681_p9) target bundleno = 613 (0x265), region = 48 }
 0x23c   : > { %s1040_s26 = spop.drf %827 }
 0x23d   : > { %p682_p10 = scmp.le.s32.totalorder %s1040_s26, 0 }
 0x23e   : > { %s887_s21 = smov (!%p682_p10), %s1034_s10   ;;  %s891_s27 = smov (!%p682_p10), %s1022_s6  }
 0x23f   : > { %623 = sbr.rel (%p682_p10) target bundleno = 588 (0x24c), region = 124  ;;  %s895_s12 = smov (!%p682_p10), 0  }
 0x240   : > { %s899_s13 = smov (!%p682_p10), 0  }
 0x244 LB: >> { %v527_v22 = vld [vmem:[%s893_s27] sm:$0xff]  ;;  %v529_v23 = vld [vmem:[%s893_s27 + $0x8] sm:$0xff]  ;;  %v531_v24 = vld [vmem:[%s893_s27 + $0x10] sm:$0xff]  ;;  %s533_s14 = sadd.s32 1, %s897_s12  ;;  %s521_s13 = sadd.s32 1, %s901_s13   ;;  %s901_s13 = sphi %s899_s13, %s521_s13   ;;  %s897_s12 = sphi %s895_s12, %s896_s12   ;;  %s893_s27 = sphi %s891_s27, %s538_s27   ;;  %s889_s21 = sphi %s887_s21, %s539_s21  }
 0x245   : >> { %528 = vst [vmem:[%s889_s21] sm:$0xff] %v527_v22  ;;  %530 = vst [vmem:[%s889_s21 + $0x8] sm:$0xff] %v529_v23  ;;  %p534_p11 = scmp.ge.s32.totalorder %s533_s14, %s1040_s26  ;;  %p520_p12 = scmp.ge.s32.totalorder %s521_s13, %s1040_s26 }
 0x246   : >> { %532 = vst [vmem:[%s889_s21 + $0x10] sm:$0xff] %v531_v24 }
 0x247   : >> { %s1076_s14 = smov (%p534_p11, %s533_s14), 0  ;;  %523 = sbr.rel (!%p520_p12) target bundleno = 580 (0x244), region = 130 }
 0x248   : >> { %s536_s15 = smul.u32 24, %s1076_s14  ;;  %s896_s12 = smov %s1076_s14  }
 0x24a   : >> { %s538_s27 = scalar_lea.vmem %s1022_s6, %s536_s15 [#allocation2]   ;;  %s539_s21 = scalar_lea.vmem %s1034_s10, %s536_s15  }
 0x24c PF: > { %829 = sdivrem.u32 %s1074_s18, 3 }
 0x24d   : > { %s683_s16 = smul.u32 24, %s1040_s26 }
 0x24f   : > { %s544_s17 = scalar_lea.vmem %s1022_s6, %s683_s16 [#allocation2]   ;;  %s546_s20 = scalar_lea.vmem %s1034_s10, %s683_s16  }
 0x255   : > { %s830_s23 = spop.drf %829 }
 0x256   : > { %p685_p13 = scmp.le.s32.totalorder %s830_s23, 0 }
 0x257   : > { %s903_s24 = smov (!%p685_p13), %s546_s20   ;;  %s907_s28 = smov (!%p685_p13), %s544_s17  }
 0x258   : > { %637 = sbr.rel (%p685_p13) target bundleno = 613 (0x265), region = 135  ;;  %s911_s29 = smov (!%p685_p13), 0  }
 0x259   : > { %s915_s30 = smov (!%p685_p13), 0  }
 0x25d LB: >> { %v556_v25 = vld [vmem:[%s909_s28] sm:$0xff]  ;;  %s558_s7 = sadd.s32 1, %s913_s29  ;;  %s550_s30 = sadd.s32 1, %s917_s30   ;;  %s917_s30 = sphi %s915_s30, %s550_s30   ;;  %s913_s29 = sphi %s911_s29, %s912_s29   ;;  %s909_s28 = sphi %s907_s28, %s563_s28   ;;  %s905_s24 = sphi %s903_s24, %s564_s24  }
 0x25e   : >> { %557 = vst [vmem:[%s905_s24] sm:$0xff] %v556_v25  ;;  %p559_p0 = scmp.ge.s32.totalorder %s558_s7, %s830_s23  ;;  %p549_p1 = scmp.ge.s32.totalorder %s550_s30, %s830_s23 }
 0x260   : >> { %s1078_s7 = smov (%p559_p0, %s558_s7), 0  ;;  %552 = sbr.rel (!%p549_p1) target bundleno = 605 (0x25d), region = 141 }
 0x261   : >> { %s686_s6 = sshll.u32 %s1078_s7, 3  ;;  %s912_s29 = smov %s1078_s7  }
 0x262   : >> { %s563_s28 = scalar_lea.vmem %s544_s17, %s686_s6 [#allocation2]   ;;  %s564_s24 = scalar_lea.vmem %s546_s20, %s686_s6  }
 0x265 PF: > { %p12_p2 = scmp.ge.s32.totalorder %s966_s22, 4   ;;  %s1070_s18 = smov %s881_s19 }
 0x266   : > { %s1071_s19 = smov %s974_s25  ;;  %s1072_s20 = smov %s966_s22 }
 0x267   :  { %14 = sbr.rel (!%p12_p2) target bundleno = 2 (0x2), region = 152 }

// kernel: vit_forward.13
= control target key start
LH: loop header
LB: loop body
LE: loop exit
PB: predicated region body
PF: predicated region fallthrough
CT: control target
= control target key end

     0   :  { %s1508_s6 = smov 0   ;;  %s1775_s0 = inlined_call_operand.vmem [shape: f32[2,17,96], index: 0, kind: input, shape index: {}]   ;;  %s1776_s1 = inlined_call_operand.vmem [shape: f32[2,17,32], index: 1, kind: output, shape index: {}]  }
   0x1 LB: > { %s1184_s7 = sadd.s32 4294967295, %s1480_s6   ;;  %p1188_p0 = scmp.ge.s32.totalorder %s1480_s6, 1  ;;  %s1480_s6 = sphi %s1508_s6, %s11_s6  }
   0x2   : > { %p87_p1 = scmp.lt.s32.totalorder %s1480_s6, 3 }
   0x4   : > { %p88_p2 = pnand %p1188_p0, %p87_p1 }
   0x5   : > { %p107_p3 = scmp.lt.s32.totalorder (!%p88_p2), %s1184_s7, 1  ;;  %s1484_s12 = smov (!%p88_p2), 96  }
   0x6   : > { %91 = sbr.rel (%p88_p2) target bundleno = 1604 (0x644), region = 24  ;;  %s1485_s13 = smov (!%p88_p2), 64  }
   0x7   : > { %s1486_s14 = smov (!%p88_p2), 88   ;;  %s1487_s15 = smov (!%p88_p2), 120  }
   0x8   : > { %s1488_s16 = smov (!%p88_p2), 80   ;;  %s1489_s17 = smov (!%p88_p2), 72  }
   0x9   : > { %s1490_s18 = smov (!%p88_p2), 104   ;;  %s1491_s19 = smov (!%p88_p2), 112  }
   0xa   : > { %s1492_s20 = smov (!%p88_p2), 56   ;;  %s1493_s21 = smov (!%p88_p2), 48  }
   0xb   : > { %v1482_v0 = vmov 0.0   ;;  %s1778_s7 = smov (!%p107_p3, %s1184_s7), 1  ;;  %vm1483_vm0 = vmmov 0   ;;  %vm129_vm1 = vcmask 64512   ;;  %vm225_vm2 = vcmask 138240   ;;  %s1494_s22 = smov 40  }
   0xc   : > { %1281 = vmatprep.subr.mxu0 %v1482_v0  ;;  %1296 = vmatprep.subr.mxu1 %v1482_v0  ;;  %s1401_s8 = smul.u32 24, %s1778_s7  ;;  %vm232_vm3 = vcmask 131072   ;;  %vm277_vm4 = vcmask 1040384   ;;  %s1495_s23 = smov 8   ;;  %vm1116_vm5 = vcmask 130048   ;;  %vm1120_vm6 = vcmask 195584  }
   0xd   : > { %1287 = vmatprep.mubr.msk.f32.mxu0 %vm1483_vm0, %v1482_v0  ;;  %1302 = vmatprep.mubr.msk.f32.mxu1 %vm1483_vm0, %v1482_v0  ;;  %s1496_s24 = smov 16   ;;  %s1497_s25 = smov 24   ;;  %vm1124_vm7 = vcmask 261120   ;;  %vm1127_vm8 = vcmask 253952  }
   0xe   : > { %s111_s11 = scalar_lea.vmem %s1775_s0, %s1401_s8  ;;  %s116_s28 = scalar_lea.vmem %s1776_s1, %s1401_s8 }
   0xf   : > { %v1530_v1 = vld [vmem:[%s111_s11 + $0x10] sm:$0x1]  ;;  %v1532_v2 = vld [vmem:[%s111_s11] sm:$0xff]  ;;  %v1536_v3 = vld [vmem:[%s111_s11 + $0x8] sm:$0xff] }
  0x10   : > { %127 = vrot.lane.b32.xlu0 %v1530_v1, %s1484_s12  ;;  %123 = vrot.lane.b32.xlu1 %v1532_v2, %s1484_s12 }
  0x14   : > { %125 = vrot.lane.b32.xlu0 %v1536_v3, %s1484_s12 }
  0x82   : > { %v128_v4 = vpop.permute.xlu0 %127  ;;  %v124_v6 = vpop.permute.xlu1 %123 }
  0x83   : > { %1282 = vmatpush3.xpose.msk.msra.mxu0 %vm129_vm1, %v128_v4 }
  0x84   : > { %1283 = vmatprep.subr.mxu0 %v1482_v0 }
  0x86   : > { %v126_v5 = vpop.permute.xlu0 %125 }
  0x87   : > { %1284 = vmatpush3.xpose.msk.msra.mxu0 %vm129_vm1, %v126_v5 }
  0x88   : > { %1285 = vmatprep.subr.mxu0 %v1482_v0 }
  0x8b   : > { %1286 = vmatpush3.xpose.msk.msra.mxu0 %vm129_vm1, %v124_v6 }
  0x8c   : > { %1326 = vmatprep.subr.mxu0 %v1482_v0 }
  0x8e   : > { %1288 = vmatmul.mubr.msk.f32.vlgmr.msra.gmra.mxu0 %vm129_vm1, %v1532_v2 }
  0x8f   : > { %1290 = vmatprep.mubr.msk.f32.mxu0 %vm1483_vm0, %v1482_v0 }
  0x92   : > { %1291 = vmatmul.mubr.msk.f32.gmra.mxu0 %vm129_vm1, %v1536_v3 }
  0x93   : > { %1293 = vmatprep.mubr.msk.f32.mxu0 %vm1483_vm0, %v1482_v0 }
  0x96   : > { %1294 = vmatmul.mubr.msk.f32.gmra.mxu0 %vm129_vm1, %v1530_v1 }
  0x97   : > { %1332 = vmatprep.mubr.msk.f32.mxu0 %vm1483_vm0, %v1482_v0 }
 0x14e   : > { %v208_v7 = vpop.f32.mrf.mxu0 }
 0x14f   : > { %v222_v8 = vmul.f32 0.35355338, %v208_v7 }
 0x150   : > { %v1289_v9 = vpop.f32.mrf.mxu0 }
 0x151   : > { %v226_v10 = vsel %vm225_vm2, %v222_v8, -inf }
 0x152   : > { %227 = vmax.xlane.f32.xlu1 %v226_v10  ;;  %v213_v11 = vpop.f32.mrf.mxu0 }
 0x153   : > { %v223_v12 = vmul.f32 0.35355338, %v213_v11 }
 0x154   : > { %v1292_v13 = vpop.f32.mrf.mxu0 }
 0x155   : > { %v229_v14 = vsel %vm225_vm2, %v223_v12, -inf }
 0x156   : > { %230 = vmax.xlane.f32.xlu0 %v229_v14  ;;  %v218_v15 = vpop.f32.mrf.mxu0 }
 0x157   : > { %v224_v16 = vmul.f32 0.35355338, %v218_v15 }
 0x158   : > { %v1295_v17 = vpop.f32.mrf.mxu0 }
 0x159   : > { %v233_v18 = vsel %vm232_vm3, %v224_v16, -inf }
 0x15a   : > { %234 = vmax.xlane.f32.xlu0 %v233_v18 }
 0x163   : > { %262 = vrot.lane.b32.xlu1 %v1536_v3, %s1485_s13 }
 0x167   : > { %260 = vrot.lane.b32.xlu1 %v1532_v2, %s1485_s13 }
 0x170   : > { %264 = vrot.lane.b32.xlu0 %v1530_v1, %s1485_s13 }
 0x1db   : > { %v228_v19 = vpop.xlane.xlu1 %227 }
 0x1dc   : > { %v236_v20 = vsub.f32 %v222_v8, %v228_v19 }
 0x1de   : > { %v239_v21 = vmul.f32 1.442695, %v236_v20 }
 0x1df   : > { %v231_v22 = vpop.xlane.xlu0 %230  ;;  %v263_v26 = vpop.permute.xlu1 %262 }
 0x1e0   : > { %1426 = vpow2.f32 %v239_v21  ;;  %v237_v23 = vsub.f32 %v223_v12, %v231_v22 }
 0x1e2   : > { %v241_v24 = vmul.f32 1.442695, %v237_v23 }
 0x1e3   : > { %v235_v25 = vpop.xlane.xlu0 %234  ;;  %v261_v28 = vpop.permute.xlu1 %260 }
 0x1e4   : > { %1428 = vpow2.f32 %v241_v24  ;;  %v238_v33 = vsub.f32 %v224_v16, %v235_v25 }
 0x1e6   : > { %v243_v34 = vmul.f32 1.442695, %v238_v33 }
 0x1e7   : > { %v265_v27 = vpop.permute.xlu0 %264 }
 0x1e8   : > { %1297 = vmatpush3.msk.msra.mxu1 %vm277_vm4, %v265_v27  ;;  %1430 = vpow2.f32 %v243_v34 }
 0x1e9   : > { %1298 = vmatprep.subr.mxu1 %v1482_v0 }
 0x1ea   : > { %1299 = vmatpush3.msra.mxu1 %v263_v26 }
 0x1eb   : > { %1300 = vmatprep.subr.mxu1 %v1482_v0 }
 0x1ec   : > { %1301 = vmatpush3.msra.mxu1 %v261_v28 }
 0x1ed   : > { %v1427_v29 = vpop.eup %1426  ;;  %1311 = vmatprep.subr.mxu1 %v1482_v0 }
 0x1ee   : > { %v245_v30 = vsel %vm225_vm2, %v1427_v29, 0.0 }
 0x1ef   : > { %246 = vadd.xlane.f32.xlu1 %v245_v30 }
 0x1f1   : > { %v1429_v31 = vpop.eup %1428 }
 0x1f2   : > { %v248_v32 = vsel %vm225_vm2, %v1429_v31, 0.0 }
 0x1f3   : > { %249 = vadd.xlane.f32.xlu0 %v248_v32 }
 0x1f5   : > { %v1431_v35 = vpop.eup %1430 }
 0x1f6   : > { %v251_v36 = vsel %vm232_vm3, %v1431_v35, 0.0 }
 0x200   : > { %368 = vrot.lane.b32.xlu1 %v1536_v3, %s1486_s14 }
 0x204   : > { %360 = vrot.lane.b32.xlu1 %v1532_v2, %s1487_s15 }
 0x209   : > { %370 = vrot.lane.b32.xlu0 %v1530_v1, %s1486_s14 }
 0x20d   : > { %366 = vrot.lane.b32.xlu0 %v1532_v2, %s1486_s14 }
 0x211   : > { %609 = vrot.lane.b32.xlu0 %v1530_v1, %s1488_s16 }
 0x215   : > { %607 = vrot.lane.b32.xlu0 %v1536_v3, %s1488_s16 }
 0x219   : > { %605 = vrot.lane.b32.xlu0 %v1532_v2, %s1488_s16 }
 0x21d   : > { %848 = vrot.lane.b32.xlu0 %v1530_v1, %s1489_s17 }
 0x221   : > { %846 = vrot.lane.b32.xlu0 %v1536_v3, %s1489_s17 }
 0x225   : > { %844 = vrot.lane.b32.xlu0 %v1532_v2, %s1489_s17 }
 0x228   : > { %252 = vadd.xlane.f32.xlu1 %v251_v36 }
 0x229   : > { %840 = vrot.lane.b32.xlu0 %v1536_v3, %s1490_s18 }
 0x22d   : > { %504 = vrot.lane.b32.xlu0 %v1530_v1, %s1492_s20 }
 0x239   : > { %362 = vrot.lane.b32.xlu1 %v1536_v3, %s1487_s15 }
 0x23d   : > { %364 = vrot.lane.b32.xlu1 %v1530_v1, %s1487_s15 }
 0x241   : > { %599 = vrot.lane.b32.xlu1 %v1532_v2, %s1491_s19 }
 0x245   : > { %601 = vrot.lane.b32.xlu1 %v1536_v3, %s1491_s19 }
 0x249   : > { %603 = vrot.lane.b32.xlu1 %v1530_v1, %s1491_s19 }
 0x24d   : > { %838 = vrot.lane.b32.xlu1 %v1532_v2, %s1490_s18 }
 0x251   : > { %842 = vrot.lane.b32.xlu1 %v1530_v1, %s1490_s18 }
 0x278   : > { %v247_v37 = vpop.xlane.xlu1 %246 }
 0x279   : > { %1432 = vrcp.f32 %v247_v37 }
 0x27c   : > { %v250_v38 = vpop.xlane.xlu0 %249  ;;  %v369_v44 = vpop.permute.xlu1 %368 }
 0x27d   : > { %1434 = vrcp.f32 %v250_v38 }
 0x280   : > { %v371_v40 = vpop.permute.xlu0 %370  ;;  %v361_v46 = vpop.permute.xlu1 %360 }
 0x284   : > { %v367_v45 = vpop.permute.xlu0 %366 }
 0x286   : > { %v1433_v39 = vpop.eup %1432 }
 0x287   : > { %v257_v41 = vmul.f32 %v1433_v39, %v1427_v29 }
 0x288   : > { %v610_v48 = vpop.permute.xlu0 %609 }
 0x289   : > { %1303 = vmatmul.mubr.msk.f32.vlgmr.msra.gmra.mxu1 %vm225_vm2, %v257_v41 }
 0x28a   : > { %v1435_v42 = vpop.eup %1434  ;;  %1312 = vmatpush3.xpose.msk.msra.mxu1 %vm129_vm1, %v371_v40  ;;  %1305 = vmatprep.mubr.msk.f32.mxu1 %vm1483_vm0, %v1482_v0 }
 0x28b   : > { %1313 = vmatprep.subr.mxu1 %v1482_v0  ;;  %v258_v43 = vmul.f32 %v1435_v42, %v1429_v31 }
 0x28c   : > { %v608_v52 = vpop.permute.xlu0 %607 }
 0x28d   : > { %1306 = vmatmul.mubr.msk.f32.gmra.mxu1 %vm225_vm2, %v258_v43 }
 0x28e   : > { %1314 = vmatpush3.xpose.msk.msra.mxu1 %vm129_vm1, %v369_v44  ;;  %1308 = vmatprep.mubr.msk.f32.mxu1 %vm1483_vm0, %v1482_v0 }
 0x28f   : > { %1315 = vmatprep.subr.mxu1 %v1482_v0 }
 0x290   : > { %v606_v54 = vpop.permute.xlu0 %605 }
 0x292   : > { %1316 = vmatpush3.xpose.msk.msra.mxu1 %vm129_vm1, %v367_v45 }
 0x293   : > { %1341 = vmatprep.subr.mxu1 %v1482_v0 }
 0x294   : > { %v849_v56 = vpop.permute.xlu0 %848 }
 0x298   : > { %v847_v58 = vpop.permute.xlu0 %846 }
 0x29c   : > { %v845_v60 = vpop.permute.xlu0 %844 }
 0x2a0   : > { %v841_v62 = vpop.permute.xlu0 %840 }
 0x2a4   : > { %v505_v8 = vpop.permute.xlu0 %504 }
 0x2a5   : > { %1327 = vmatpush3.msk.msra.mxu0 %vm277_vm4, %v505_v8 }
 0x2a6   : > { %1328 = vmatprep.subr.mxu0 %v1482_v0 }
 0x2b1   : > { %v253_v47 = vpop.xlane.xlu1 %252 }
 0x2b2   : > { %1436 = vrcp.f32 %v253_v47 }
 0x2b5   : > { %v363_v49 = vpop.permute.xlu1 %362 }
 0x2b9   : > { %v365_v53 = vpop.permute.xlu1 %364 }
 0x2bd   : > { %v600_v55 = vpop.permute.xlu1 %599 }
 0x2bf   : > { %v1437_v50 = vpop.eup %1436 }
 0x2c0   : > { %v259_v51 = vmul.f32 %v1437_v50, %v1431_v35 }
 0x2c1   : > { %v602_v57 = vpop.permute.xlu1 %601 }
 0x2c2   : > { %1309 = vmatmul.mubr.msk.f32.gmra.mxu1 %vm225_vm2, %v259_v51 }
 0x2c3   : > { %1317 = vmatprep.mubr.msk.f32.mxu1 %vm1483_vm0, %v1482_v0 }
 0x2c5   : > { %v604_v59 = vpop.permute.xlu1 %603 }
 0x2c6   : > { %1318 = vmatmul.mubr.msk.f32.vlgmr.msra.gmra.mxu1 %vm129_vm1, %v361_v46 }
 0x2c7   : > { %1342 = vmatpush3.xpose.msk.msra.mxu1 %vm129_vm1, %v610_v48  ;;  %1320 = vmatprep.mubr.msk.f32.mxu1 %vm1483_vm0, %v1482_v0 }
 0x2c8   : > { %1343 = vmatprep.subr.mxu1 %v1482_v0 }
 0x2c9   : > { %v839_v61 = vpop.permute.xlu1 %838 }
 0x2ca   : > { %1321 = vmatmul.mubr.msk.f32.gmra.mxu1 %vm129_vm1, %v363_v49 }
 0x2cb   : > { %1344 = vmatpush3.xpose.msk.msra.mxu1 %vm129_vm1, %v608_v52  ;;  %1323 = vmatprep.mubr.msk.f32.mxu1 %vm1483_vm0, %v1482_v0 }
 0x2cc   : > { %1345 = vmatprep.subr.mxu1 %v1482_v0 }
 0x2cd   : > { %v843_v63 = vpop.permute.xlu1 %842 }
 0x2ce   : > { %1324 = vmatmul.mubr.msk.f32.gmra.mxu1 %vm129_vm1, %v365_v53 }
 0x2cf   : > { %1346 = vmatpush3.xpose.msk.msra.mxu1 %vm129_vm1, %v606_v54  ;;  %1347 = vmatprep.mubr.msk.f32.mxu1 %vm1483_vm0, %v1482_v0 }
 0x2d0   : > { %1371 = vmatprep.subr.mxu1 %v1482_v0 }
 0x2d2   : > { %1348 = vmatmul.mubr.msk.f32.vlgmr.msra.gmra.mxu1 %vm129_vm1, %v600_v55 }
 0x2d3   : > { %1372 = vmatpush3.xpose.msk.msra.mxu1 %vm129_vm1, %v849_v56  ;;  %1350 = vmatprep.mubr.msk.f32.mxu1 %vm1483_vm0, %v1482_v0 }
 0x2d4   : > { %1373 = vmatprep.subr.mxu1 %v1482_v0 }
 0x2d6   : > { %1351 = vmatmul.mubr.msk.f32.gmra.mxu1 %vm129_vm1, %v602_v57 }
 0x2d7   : > { %1374 = vmatpush3.xpose.msk.msra.mxu1 %vm129_vm1, %v847_v58  ;;  %1353 = vmatprep.mubr.msk.f32.mxu1 %vm1483_vm0, %v1482_v0 }
 0x2d8   : > { %1375 = vmatprep.subr.mxu1 %v1482_v0 }
 0x2da   : > { %1354 = vmatmul.mubr.msk.f32.gmra.mxu1 %vm129_vm1, %v604_v59 }
 0x2db   : > { %1376 = vmatpush3.xpose.msk.msra.mxu1 %vm129_vm1, %v845_v60  ;;  %1377 = vmatprep.mubr.msk.f32.mxu1 %vm1483_vm0, %v1482_v0 }
 0x2de   : > { %1378 = vmatmul.mubr.msk.f32.vlgmr.msra.gmra.mxu1 %vm129_vm1, %v839_v61 }
 0x2df   : > { %1380 = vmatprep.mubr.msk.f32.mxu1 %vm1483_vm0, %v1482_v0 }
 0x2e2   : > { %1381 = vmatmul.mubr.msk.f32.gmra.mxu1 %vm129_vm1, %v841_v62 }
 0x2e3   : > { %1383 = vmatprep.mubr.msk.f32.mxu1 %vm1483_vm0, %v1482_v0 }
 0x2e6   : > { %1384 = vmatmul.mubr.msk.f32.gmra.mxu1 %vm129_vm1, %v843_v63 }
 0x349   : > { %v1641_v4 = vpop.f32.mrf.mxu1 }
 0x34b   : > { %v1304_v5 = vpop.f32.mrf.mxu1 }
 0x34d   : > { %v1643_v6 = vpop.f32.mrf.mxu1 }
 0x34f   : > { %v1307_v7 = vpop.f32.mrf.mxu1 }
 0x382   : > { %v1647_v9 = vpop.f32.mrf.mxu1 }
 0x384   : > { %v1310_v10 = vpop.f32.mrf.mxu1 }
 0x386   : > { %v450_v11 = vpop.f32.mrf.mxu1 }
 0x387   : > { %v464_v12 = vmul.f32 0.35355338, %v450_v11 }
 0x388   : > { %v1319_v13 = vpop.f32.mrf.mxu1 }
 0x389   : > { %v467_v14 = vsel %vm225_vm2, %v464_v12, -inf }
 0x38a   : > { %468 = vmax.xlane.f32.xlu0 %v467_v14  ;;  %v455_v15 = vpop.f32.mrf.mxu1 }
 0x38b   : > { %v465_v16 = vmul.f32 0.35355338, %v455_v15 }
 0x38c   : > { %v1322_v17 = vpop.f32.mrf.mxu1 }
 0x38d   : > { %v470_v18 = vsel %vm225_vm2, %v465_v16, -inf }
 0x38e   : > { %471 = vmax.xlane.f32.xlu1 %v470_v18  ;;  %v460_v19 = vpop.f32.mrf.mxu1 }
 0x38f   : > { %v466_v20 = vmul.f32 0.35355338, %v460_v19 }
 0x390   : > { %v1325_v21 = vpop.f32.mrf.mxu1 }
 0x391   : > { %v473_v22 = vsel %vm232_vm3, %v466_v20, -inf }
 0x392   : > { %474 = vmax.xlane.f32.xlu0 %v473_v22  ;;  %v689_v23 = vpop.f32.mrf.mxu1 }
 0x393   : > { %v703_v24 = vmul.f32 0.35355338, %v689_v23 }
 0x394   : > { %v1349_v25 = vpop.f32.mrf.mxu1 }
 0x395   : > { %v706_v26 = vsel %vm225_vm2, %v703_v24, -inf }
 0x396   : > { %707 = vmax.xlane.f32.xlu0 %v706_v26  ;;  %v694_v27 = vpop.f32.mrf.mxu1 }
 0x397   : > { %v1653_v28 = vmul.f32 0.35355338, %v694_v27 }
 0x398   : > { %v1352_v29 = vpop.f32.mrf.mxu1 }
 0x399   : > { %v709_v30 = vsel %vm225_vm2, %v1653_v28, -inf }
 0x39a   : > { %710 = vmax.xlane.f32.xlu1 %v709_v30  ;;  %v699_v31 = vpop.f32.mrf.mxu1 }
 0x39b   : > { %v705_v32 = vmul.f32 0.35355338, %v699_v31 }
 0x39c   : > { %v1355_v33 = vpop.f32.mrf.mxu1 }
 0x39d   : > { %v712_v34 = vsel %vm232_vm3, %v705_v32, -inf }
 0x39e   : > { %713 = vmax.xlane.f32.xlu0 %v712_v34  ;;  %v928_v35 = vpop.f32.mrf.mxu1 }
 0x39f   : > { %v942_v36 = vmul.f32 0.35355338, %v928_v35 }
 0x3a0   : > { %v1379_v37 = vpop.f32.mrf.mxu1 }
 0x3a1   : > { %v945_v38 = vsel %vm225_vm2, %v942_v36, -inf }
 0x3a2   : > { %946 = vmax.xlane.f32.xlu1 %v945_v38  ;;  %v933_v39 = vpop.f32.mrf.mxu1 }
 0x3a3   : > { %v1663_v43 = vmul.f32 0.35355338, %v933_v39 }
 0x3a4   : > { %v1382_v40 = vpop.f32.mrf.mxu1 }
 0x3a5   : > { %v948_v45 = vsel %vm225_vm2, %v1663_v43, -inf }
 0x3a6   : > { %v938_v41 = vpop.f32.mrf.mxu1 }
 0x3a7   : > { %v1665_v44 = vmul.f32 0.35355338, %v938_v41 }
 0x3a8   : > { %v1385_v42 = vpop.f32.mrf.mxu1 }
 0x3a9   : > { %v951_v46 = vsel %vm232_vm3, %v1665_v44, -inf }
 0x3b3   : > { %502 = vrot.lane.b32.xlu1 %v1536_v3, %s1492_s20 }
 0x3b4   : > { %500 = vrot.lane.b32.xlu0 %v1532_v2, %s1492_s20 }
 0x3d3   : > { %949 = vmax.xlane.f32.xlu0 %v948_v45 }
 0x3d7   : > { %952 = vmax.xlane.f32.xlu1 %v951_v46 }
 0x3e8   : > { %741 = vrot.lane.b32.xlu1 %v1536_v3, %s1493_s21 }
 0x3e9   : > { %743 = vrot.lane.b32.xlu0 %v1530_v1, %s1493_s21 }
 0x3ec   : > { %739 = vrot.lane.b32.xlu1 %v1532_v2, %s1493_s21 }
 0x413   : > { %v469_v47 = vpop.xlane.xlu0 %468 }
 0x414   : > { %v476_v48 = vsub.f32 %v464_v12, %v469_v47 }
 0x416   : > { %v479_v49 = vmul.f32 1.442695, %v476_v48 }
 0x417   : > { %v472_v50 = vpop.xlane.xlu1 %471 }
 0x418   : > { %1438 = vpow2.f32 %v479_v49  ;;  %v477_v51 = vsub.f32 %v465_v16, %v472_v50 }
 0x41a   : > { %v481_v52 = vmul.f32 1.442695, %v477_v51 }
 0x41b   : > { %v475_v53 = vpop.xlane.xlu0 %474 }
 0x41c   : > { %1440 = vpow2.f32 %v481_v52  ;;  %v478_v54 = vsub.f32 %v466_v20, %v475_v53 }
 0x41e   : > { %v483_v55 = vmul.f32 1.442695, %v478_v54 }
 0x41f   : > { %v708_v56 = vpop.xlane.xlu0 %707 }
 0x420   : > { %1442 = vpow2.f32 %v483_v55  ;;  %v715_v57 = vsub.f32 %v703_v24, %v708_v56 }
 0x422   : > { %v718_v58 = vmul.f32 1.442695, %v715_v57 }
 0x423   : > { %v711_v61 = vpop.xlane.xlu1 %710 }
 0x424   : > { %1444 = vpow2.f32 %v718_v58  ;;  %v716_v23 = vsub.f32 %v1653_v28, %v711_v61 }
 0x425   : > { %v1674_v59 = vpop.eup %1438 }
 0x426   : > { %v485_v60 = vsel %vm225_vm2, %v1674_v59, 0.0  ;;  %v720_v24 = vmul.f32 1.442695, %v716_v23 }
 0x427   : > { %486 = vadd.xlane.f32.xlu0 %v485_v60  ;;  %v714_v62 = vpop.xlane.xlu0 %713 }
 0x428   : > { %v717_v63 = vsub.f32 %v705_v32, %v714_v62 }
 0x429   : > { %v1678_v5 = vpop.eup %1440 }
 0x42a   : > { %v722_v7 = vmul.f32 1.442695, %v717_v63  ;;  %v488_v8 = vsel %vm225_vm2, %v1678_v5, 0.0 }
 0x42b   : > { %v947_v10 = vpop.xlane.xlu1 %946  ;;  %489 = vadd.xlane.f32.xlu1 %v488_v8  ;;  %v501_v17 = vpop.permute.xlu0 %500 }
 0x42c   : > { %1446 = vpow2.f32 %v722_v7  ;;  %v954_v11 = vsub.f32 %v942_v36, %v947_v10 }
 0x42d   : > { %v1682_v12 = vpop.eup %1442 }
 0x42e   : > { %v957_v13 = vmul.f32 1.442695, %v954_v11  ;;  %v491_v14 = vsel %vm232_vm3, %v1682_v12, 0.0 }
 0x42f   : > { %v503_v15 = vpop.permute.xlu1 %502  ;;  %492 = vadd.xlane.f32.xlu0 %v491_v14 }
 0x430   : > { %1448 = vpow2.f32 %v957_v13  ;;  %1329 = vmatpush3.msra.mxu0 %v503_v15 }
 0x431   : > { %v1686_v16 = vpop.eup %1444  ;;  %1330 = vmatprep.subr.mxu0 %v1482_v0  ;;  %1450 = vpow2.f32 %v720_v24 }
 0x432   : > { %1331 = vmatpush3.msra.mxu0 %v501_v17  ;;  %v724_v18 = vsel %vm225_vm2, %v1686_v16, 0.0 }
 0x433   : > { %725 = vadd.xlane.f32.xlu1 %v724_v18  ;;  %1356 = vmatprep.subr.mxu0 %v1482_v0 }
 0x439   : > { %v1692_v19 = vpop.eup %1446 }
 0x43a   : > { %v730_v20 = vsel %vm232_vm3, %v1692_v19, 0.0 }
 0x43b   : > { %731 = vadd.xlane.f32.xlu1 %v730_v20 }
 0x43d   : > { %v1696_v21 = vpop.eup %1448 }
 0x43e   : > { %v963_v22 = vsel %vm225_vm2, %v1696_v21, 0.0  ;;  %v1451_v29 = vpop.eup %1450 }
 0x43f   : > { %964 = vadd.xlane.f32.xlu1 %v963_v22  ;;  %v727_v33 = vsel %vm225_vm2, %v1451_v29, 0.0 }
 0x445   : > { %982 = vrot.lane.b32.xlu0 %v1530_v1, %s1494_s22 }
 0x45c   : > { %v950_v25 = vpop.xlane.xlu0 %949 }
 0x45d   : > { %v955_v26 = vsub.f32 %v1663_v43, %v950_v25 }
 0x45f   : > { %v959_v27 = vmul.f32 1.442695, %v955_v26 }
 0x460   : > { %v953_v30 = vpop.xlane.xlu1 %952  ;;  %v744_v37 = vpop.permute.xlu0 %743 }
 0x461   : > { %1452 = vpow2.f32 %v959_v27  ;;  %v956_v31 = vsub.f32 %v1665_v44, %v953_v30 }
 0x463   : > { %v961_v32 = vmul.f32 1.442695, %v956_v31 }
 0x464   : > { %728 = vadd.xlane.f32.xlu0 %v727_v33  ;;  %v742_v36 = vpop.permute.xlu1 %741 }
 0x465   : > { %1454 = vpow2.f32 %v961_v32 }
 0x468   : > { %v740_v38 = vpop.permute.xlu1 %739 }
 0x46e   : > { %v1705_v34 = vpop.eup %1452 }
 0x46f   : > { %v966_v1 = vsel %vm225_vm2, %v1705_v34, 0.0 }
 0x470   : > { %967 = vadd.xlane.f32.xlu1 %v966_v1 }
 0x472   : > { %v1709_v28 = vpop.eup %1454 }
 0x473   : > { %v969_v35 = vsel %vm232_vm3, %v1709_v28, 0.0 }
 0x474   : > { %970 = vadd.xlane.f32.xlu0 %v969_v35 }
 0x481   : > { %980 = vrot.lane.b32.xlu1 %v1536_v3, %s1494_s22 }
 0x48a   : > { %978 = vrot.lane.b32.xlu0 %v1532_v2, %s1494_s22 }
 0x4b0   : > { %v487_v39 = vpop.xlane.xlu0 %486 }
 0x4b1   : > { %1456 = vrcp.f32 %v487_v39 }
 0x4b4   : > { %v490_v40 = vpop.xlane.xlu1 %489 }
 0x4b5   : > { %1458 = vrcp.f32 %v490_v40 }
 0x4b8   : > { %v493_v41 = vpop.xlane.xlu0 %492 }
 0x4b9   : > { %1460 = vrcp.f32 %v493_v41 }
 0x4bc   : > { %v726_v42 = vpop.xlane.xlu1 %725  ;;  %v983_v49 = vpop.permute.xlu0 %982 }
 0x4bd   : > { %1462 = vrcp.f32 %v726_v42 }
 0x4be   : > { %v1457_v43 = vpop.eup %1456 }
 0x4bf   : > { %v497_v44 = vmul.f32 %v1457_v43, %v1674_v59 }
 0x4c1   : > { %1333 = vmatmul.mubr.msk.f32.vlgmr.msra.gmra.mxu0 %vm225_vm2, %v497_v44 }
 0x4c2   : > { %v1459_v45 = vpop.eup %1458  ;;  %1357 = vmatpush3.msk.msra.mxu0 %vm277_vm4, %v744_v37  ;;  %1335 = vmatprep.mubr.msk.f32.mxu0 %vm1483_vm0, %v1482_v0 }
 0x4c3   : > { %1358 = vmatprep.subr.mxu0 %v1482_v0  ;;  %v498_v2 = vmul.f32 %v1459_v45, %v1678_v5 }
 0x4c4   : > { %1359 = vmatpush3.msra.mxu0 %v742_v36  ;;  %v732_v50 = vpop.xlane.xlu1 %731 }
 0x4c5   : > { %1360 = vmatprep.subr.mxu0 %v1482_v0  ;;  %1336 = vmatmul.mubr.msk.f32.gmra.mxu0 %vm225_vm2, %v498_v2 }
 0x4c6   : > { %v1461_v3 = vpop.eup %1460  ;;  %1361 = vmatpush3.msra.mxu0 %v740_v38  ;;  %1338 = vmatprep.mubr.msk.f32.mxu0 %vm1483_vm0, %v1482_v0 }
 0x4c7   : > { %v499_v46 = vmul.f32 %v1461_v3, %v1682_v12  ;;  %1386 = vmatprep.subr.mxu0 %v1482_v0 }
 0x4c8   : > { %v965_v52 = vpop.xlane.xlu1 %964 }
 0x4c9   : > { %1339 = vmatmul.mubr.msk.f32.gmra.mxu0 %vm225_vm2, %v499_v46 }
 0x4ca   : > { %v1463_v47 = vpop.eup %1462  ;;  %1362 = vmatprep.mubr.msk.f32.mxu0 %vm1483_vm0, %v1482_v0 }
 0x4cb   : > { %v736_v48 = vmul.f32 %v1463_v47, %v1686_v16 }
 0x4cd   : > { %1363 = vmatmul.mubr.msk.f32.vlgmr.msra.gmra.mxu0 %vm225_vm2, %v736_v48 }
 0x4ce   : > { %1387 = vmatpush3.msk.msra.mxu0 %vm277_vm4, %v983_v49  ;;  %1365 = vmatprep.mubr.msk.f32.mxu0 %vm1483_vm0, %v1482_v0 }
 0x4cf   : > { %1388 = vmatprep.subr.mxu0 %v1482_v0 }
 0x4ed   : > { %v729_v51 = vpop.xlane.xlu0 %728 }
 0x4ee   : > { %1464 = vrcp.f32 %v729_v51 }
 0x4ef   : > { %1466 = vrcp.f32 %v732_v50 }
 0x4f0   : > { %1468 = vrcp.f32 %v965_v52 }
 0x4f9   : > { %v968_v53 = vpop.xlane.xlu1 %967 }
 0x4fa   : > { %1470 = vrcp.f32 %v968_v53 }
 0x4fb   : > { %v1465_v54 = vpop.eup %1464 }
 0x4fc   : > { %v737_v55 = vmul.f32 %v1465_v54, %v1451_v29  ;;  %v1467_v56 = vpop.eup %1466 }
 0x4fd   : > { %v981_v57 = vpop.permute.xlu1 %980  ;;  %v971_v58 = vpop.xlane.xlu0 %970  ;;  %v738_v59 = vmul.f32 %v1467_v56, %v1692_v19 }
 0x4fe   : > { %1472 = vrcp.f32 %v971_v58  ;;  %1366 = vmatmul.mubr.msk.f32.gmra.mxu0 %vm225_vm2, %v737_v55  ;;  %v1469_v60 = vpop.eup %1468 }
 0x4ff   : > { %1389 = vmatpush3.msra.mxu0 %v981_v57  ;;  %1368 = vmatprep.mubr.msk.f32.mxu0 %vm1483_vm0, %v1482_v0  ;;  %v975_v62 = vmul.f32 %v1469_v60, %v1696_v21 }
 0x500   : > { %1390 = vmatprep.subr.mxu0 %v1482_v0 }
 0x501   : > { %v979_v61 = vpop.permute.xlu0 %978 }
 0x502   : > { %1369 = vmatmul.mubr.msk.f32.gmra.mxu0 %vm225_vm2, %v738_v59 }
 0x503   : > { %1391 = vmatpush3.msra.mxu0 %v979_v61  ;;  %1392 = vmatprep.mubr.msk.f32.mxu0 %vm1483_vm0, %v1482_v0 }
 0x506   : > { %1393 = vmatmul.mubr.msk.f32.vlgmr.msra.gmra.mxu0 %vm225_vm2, %v975_v62 }
 0x507   : > { %v1471_v63 = vpop.eup %1470  ;;  %1395 = vmatprep.mubr.msk.f32.mxu0 %vm1483_vm0, %v1482_v0 }
 0x508   : > { %v976_v5 = vmul.f32 %v1471_v63, %v1705_v34 }
 0x50a   : > { %1396 = vmatmul.mubr.msk.f32.gmra.mxu0 %vm225_vm2, %v976_v5 }
 0x50b   : > { %v1473_v7 = vpop.eup %1472  ;;  %1398 = vmatprep.mubr.msk.f32.mxu0 %vm1483_vm0, %v1482_v0 }
 0x50c   : > { %v977_v8 = vmul.f32 %v1473_v7, %v1709_v28 }
 0x50e   : > { %1399 = vmatmul.mubr.msk.f32.gmra.mxu0 %vm225_vm2, %v977_v8 }
 0x581   : > { %v585_v10 = vpop.f32.mrf.mxu0 }
 0x582   : > { %1080 = vrot.lane.b32.xlu1 %v585_v10, %s1495_s23 }
 0x583   : > { %v1334_v11 = vpop.f32.mrf.mxu0 }
 0x585   : > { %v590_v12 = vpop.f32.mrf.mxu0 }
 0x586   : > { %1082 = vrot.lane.b32.xlu0 %v590_v12, %s1495_s23 }
 0x587   : > { %v1337_v13 = vpop.f32.mrf.mxu0 }
 0x589   : > { %v595_v14 = vpop.f32.mrf.mxu0 }
 0x58a   : > { %1084 = vrot.lane.b32.xlu1 %v595_v14, %s1495_s23 }
 0x58b   : > { %v1340_v15 = vpop.f32.mrf.mxu0 }
 0x58d   : > { %v824_v16 = vpop.f32.mrf.mxu0 }
 0x58e   : > { %1092 = vrot.lane.b32.xlu0 %v824_v16, %s1496_s24 }
 0x58f   : > { %v1364_v17 = vpop.f32.mrf.mxu0 }
 0x5be   : > { %v829_v18 = vpop.f32.mrf.mxu0 }
 0x5bf   : > { %1094 = vrot.lane.b32.xlu1 %v829_v18, %s1496_s24 }
 0x5c0   : > { %v1367_v0 = vpop.f32.mrf.mxu0 }
 0x5c2   : > { %v834_v19 = vpop.f32.mrf.mxu0 }
 0x5c3   : > { %1096 = vrot.lane.b32.xlu0 %v834_v19, %s1496_s24 }
 0x5c4   : > { %v1370_v20 = vpop.f32.mrf.mxu0 }
 0x5c6   : > { %v1063_v21 = vpop.f32.mrf.mxu0 }
 0x5c7   : > { %1104 = vrot.lane.b32.xlu1 %v1063_v21, %s1497_s25 }
 0x5c8   : > { %v1394_v22 = vpop.f32.mrf.mxu0 }
 0x5ca   : > { %v1068_v23 = vpop.f32.mrf.mxu0 }
 0x5cb   : > { %1106 = vrot.lane.b32.xlu0 %v1068_v23, %s1497_s25 }
 0x5cc   : > { %v1397_v24 = vpop.f32.mrf.mxu0 }
 0x5ce   : > { %v1073_v25 = vpop.f32.mrf.mxu0 }
 0x5cf   : > { %1108 = vrot.lane.b32.xlu1 %v1073_v25, %s1497_s25 }
 0x5d0   : > { %v1400_v26 = vpop.f32.mrf.mxu0 }
 0x5f4   : > { %v1081_v27 = vpop.permute.xlu1 %1080 }
 0x5f5   : > { %v1113_v33 = vsel %vm129_vm1, %v1641_v4, %v1081_v27 }
 0x5f8   : > { %v1083_v29 = vpop.permute.xlu0 %1082 }
 0x5f9   : > { %v1114_v36 = vsel %vm129_vm1, %v1643_v6, %v1083_v29 }
 0x5fc   : > { %v1085_v30 = vpop.permute.xlu1 %1084 }
 0x5fd   : > { %v1115_v39 = vsel %vm129_vm1, %v1647_v9, %v1085_v30 }
 0x600   : > { %v1093_v31 = vpop.permute.xlu0 %1092 }
 0x601   : > { %v1117_v34 = vsel %vm1116_vm5, %v1113_v33, %v1093_v31 }
 0x631   : > { %v1095_v32 = vpop.permute.xlu1 %1094 }
 0x632   : > { %v1118_v37 = vsel %vm1116_vm5, %v1114_v36, %v1095_v32 }
 0x635   : > { %v1097_v1 = vpop.permute.xlu0 %1096 }
 0x636   : > { %v1119_v40 = vsel %vm1116_vm5, %v1115_v39, %v1097_v1 }
 0x639   : > { %v1105_v28 = vpop.permute.xlu1 %1104 }
 0x63a   : > { %v1121_v35 = vsel %vm1120_vm6, %v1117_v34, %v1105_v28 }
 0x63b   : > { %1125 = vst.msk [vmem:[%s116_s28] sm:$0xff] %vm1124_vm7, %v1121_v35 }
 0x63d   : > { %v1107_v38 = vpop.permute.xlu0 %1106 }
 0x63e   : > { %v1122_v4 = vsel %vm1120_vm6, %v1118_v37, %v1107_v38 }
 0x63f   : > { %1126 = vst.msk [vmem:[%s116_s28 + $0x8] sm:$0xff] %vm1124_vm7, %v1122_v4 }
 0x641   : > { %v1109_v41 = vpop.permute.xlu1 %1108 }
 0x642   : > { %v1123_v42 = vsel %vm1120_vm6, %v1119_v40, %v1109_v41 }
 0x643   : > { %1128 = vst.msk [vmem:[%s116_s28 + $0x10] sm:$0x1] %vm1127_vm8, %v1123_v42 }
 0x644 PF: > { %s11_s6 = sadd.s32 1, %s1480_s6  }
 0x645   : > { %p8_p4 = scmp.ge.s32.totalorder %s11_s6, 4  }
 0x647   :  { %10 = sbr.rel (!%p8_p4) target bundleno = 1 (0x1), region = 54 }

</bundles_post_ra>
